<compile_context>
chip_gen: v7x
topology: tpu7x:2x2x1
jax: 0.10.0
libtpu: 0.0.40
codegen_flags: <defaults>
</compile_context>

<pallas_src>
import functools

import jax
import jax.numpy as jnp
from jax.experimental import pallas as pl
from jax.experimental.pallas import tpu as pltpu


# ------------------------------ fused kernel --------------------------------

def _fused_tcn_kernel(meta, x_ref, w_ref, o_ref):
    """Whole TCN forward in a single grid step.

    Layout: activations are (channels, B*seg_len) with the B batch elements
    laid side-by-side along the lane axis.  All weights live in one packed
    VMEM slab `w_ref`; `meta` carries static (row_off, rows, cols) entries.
    """
    f32 = jnp.float32
    B = meta["batch"]
    L = meta["num_vars"]

    def rd(entry):                         # static slice of the weight slab
        off, r, c = entry
        return w_ref[off:off + r, 0:c]

    def dilated_conv(z, w0_e, w1_e, b_e, d, seg):
        # Conv1d(kernel_size=2, dilation=d, padding=d) applied per batch
        # segment:  out = W[:,:,0] @ [0_d, y] + W[:,:,1] @ [y, 0_d] + bias
        rows = z.shape[0]
        zero = jnp.zeros((rows, d), f32)
        segs = [z[:, b * seg:(b + 1) * seg] for b in range(B)]
        tap0 = jnp.concatenate([p for b in range(B) for p in (zero, segs[b])],
                               axis=1)
        tap1 = jnp.concatenate([p for b in range(B) for p in (segs[b], zero)],
                               axis=1)
        return (jnp.dot(rd(w0_e), tap0, preferred_element_type=f32)
                + jnp.dot(rd(w1_e), tap1, preferred_element_type=f32)
                + rd(b_e))                              # (cout, B*(seg+d))

    y = x_ref[...]                                      # (c_in, B*L)
    for m in meta["blocks"]:                            # unrolled at trace time
        d = m["d"]
        out1 = jnp.maximum(
            dilated_conv(y, m["w1a"], m["w1b"], m["b1"], d, L), 0.0)
        # dropout1 = identity (eval mode)
        out2 = jnp.maximum(
            dilated_conv(out1, m["w2a"], m["w2b"], m["b2"], d, L + d), 0.0)
        # dropout2 = identity (eval mode)
        adj = (jnp.dot(out2, rd(m["adj"]), preferred_element_type=f32)
               + rd(m["adjb"]))                         # block-diag adjust_dim
        if m["has_down"]:
            res = (jnp.dot(rd(m["down"]), y, preferred_element_type=f32)
                   + rd(m["downb"]))
        else:
            res = y
        y = jnp.maximum(adj + res, 0.0)                 # (cout, B*L)

    # linear1 over channels:  z = lin_w @ y + lin_b  ->  (horizon, B*L)
    o_ref[...] = (jnp.dot(rd(meta["lin_w"]), y, preferred_element_type=f32)
                  + rd(meta["lin_b"]))


def tcn_forward(prepped, x):
    """x: (B, lookback, num_vars) -> (B, horizon, num_vars).  One pallas_call."""
    meta, slab = prepped["meta"], prepped["slab"]
    B, c0, L = x.shape
    assert B == meta["batch"] and L == meta["num_vars"]
    horizon = meta["horizon"]

    # Lane-batch the input: (B, c0, L) -> (c0, B*L).  Layout plumbing only.
    x2d = jnp.transpose(x, (1, 0, 2)).reshape(c0, B * L)

    out2d = pl.pallas_call(
        functools.partial(_fused_tcn_kernel, meta),
        out_shape=jax.ShapeDtypeStruct((horizon, B * L), jnp.float32),
        grid=(1,),
        in_specs=[pl.BlockSpec((c0, B * L), lambda i: (0, 0)),
                  pl.BlockSpec(slab.shape, lambda i: (0, 0))],
        out_specs=pl.BlockSpec((horizon, B * L), lambda i: (0, 0)),
        compiler_params=pltpu.CompilerParams(
            dimension_semantics=("arbitrary",)),
    )(x2d, slab)

    return jnp.transpose(out2d.reshape(horizon, B, L), (1, 0, 2))


# ------------------------- parameter init & prepare -------------------------

def init_tcn_params(key, lookback, horizon, num_vars, num_channels, kernel_size):
    params = {"blocks": []}
    keys = jax.random.split(key, len(num_channels) + 1)
    s = 0.1
    for i, cout in enumerate(num_channels):
        dilation = 2 ** i
        padding = (kernel_size - 1) * dilation
        cin = lookback if i == 0 else num_channels[i - 1]
        out2_dim = num_vars + 2 * padding          # = out_dim(out_dim(num_vars))
        k = jax.random.split(keys[i], 8)
        blk = dict(
            conv1_w=s * jax.random.normal(k[0], (cout, cin, kernel_size), jnp.float32),
            conv1_b=s * jax.random.normal(k[1], (cout,), jnp.float32),
            conv2_w=s * jax.random.normal(k[2], (cout, cout, kernel_size), jnp.float32),
            conv2_b=s * jax.random.normal(k[3], (cout,), jnp.float32),
            adj_w=s * jax.random.normal(k[4], (num_vars, out2_dim), jnp.float32),
            adj_b=s * jax.random.normal(k[5], (num_vars,), jnp.float32),
            dilation=dilation,
            padding=padding,
        )
        if cin != cout:  # downsample = Conv1d(in, out, 1)
            blk["down_w"] = s * jax.random.normal(k[6], (cout, cin, 1), jnp.float32)
            blk["down_b"] = s * jax.random.normal(k[7], (cout,), jnp.float32)
        params["blocks"].append(blk)
    kl = jax.random.split(keys[-1], 2)
    params["lin1_w"] = s * jax.random.normal(kl[0], (horizon, num_channels[-1]), jnp.float32)
    params["lin1_b"] = s * jax.random.normal(kl[1], (horizon,), jnp.float32)
    return params


def prepare_tcn_params(params, lookback, horizon, num_vars, num_channels,
                       kernel_size, batch):
    """One-time weight preprocessing: tap split, block-diagonal adjust_dim
    (so one dot serves every batch element), bias reshapes, and packing of
    every weight into one lane-padded (rows, 128) VMEM slab."""
    assert kernel_size == 2, "fused kernel specialised to kernel_size=2 (module default)"
    f32 = jnp.float32
    wlist = []

    def add(a):
        a = jnp.asarray(a, f32)
        assert a.ndim == 2
        wlist.append(a)
        return len(wlist) - 1

    blocks = []
    for i, blk in enumerate(params["blocks"]):
        d = int(blk["dilation"])                   # padding == dilation for k=2
        cout = num_channels[i]
        lout2 = num_vars + 2 * d                   # conv2 output length
        adj_t = jnp.asarray(blk["adj_w"], f32).T   # (lout2, num_vars)
        adj_bd = jnp.zeros((batch * lout2, batch * num_vars), f32)
        for b in range(batch):                     # block-diagonal adjust weight
            adj_bd = adj_bd.at[b * lout2:(b + 1) * lout2,
                               b * num_vars:(b + 1) * num_vars].set(adj_t)
        m = dict(
            d=d,
            has_down="down_w" in blk,
            w1a=add(blk["conv1_w"][:, :, 0]),
            w1b=add(blk["conv1_w"][:, :, 1]),
            b1=add(jnp.reshape(blk["conv1_b"], (cout, 1))),
            w2a=add(blk["conv2_w"][:, :, 0]),
            w2b=add(blk["conv2_w"][:, :, 1]),
            b2=add(jnp.reshape(blk["conv2_b"], (cout, 1))),
            adj=add(adj_bd),
            adjb=add(jnp.tile(jnp.reshape(blk["adj_b"], (1, num_vars)), (1, batch))),
        )
        if m["has_down"]:
            m["down"] = add(blk["down_w"][:, :, 0])
            m["downb"] = add(jnp.reshape(blk["down_b"], (cout, 1)))
        blocks.append(m)
    lin_w_i = add(params["lin1_w"])
    lin_b_i = add(jnp.reshape(params["lin1_b"], (horizon, 1)))

    # Pack all weights into a single lane-padded slab with 8-aligned row offsets.
    width = max(128, max(-(-w.shape[1] // 128) * 128 for w in wlist))
    parts, entries, row = [], [], 0
    for w in wlist:
        r, c = w.shape
        rp = -(-r // 8) * 8
        parts.append(jnp.pad(w, ((0, rp - r), (0, width - c))))
        entries.append((row, r, c))
        row += rp
    slab = jnp.concatenate(parts, axis=0)

    for m in blocks:
        for k in ("w1a", "w1b", "b1", "w2a", "w2b", "b2", "adj", "adjb",
                  "down", "downb"):
            if k in m:
                m[k] = entries[m[k]]
    meta = dict(blocks=blocks, lin_w=entries[lin_w_i], lin_b=entries[lin_b_i],
                batch=batch, num_vars=num_vars, horizon=horizon)
    return dict(meta=meta, slab=slab)


# ------------------------------ pure-JAX reference --------------------------

def ref_forward(params, x):
    def conv(x, w, b, dil, pad):
        out = jax.lax.conv_general_dilated(
            x, w, window_strides=(1,), padding=[(pad, pad)], rhs_dilation=(dil,),
            dimension_numbers=("NCH", "OIH", "NCH"))
        return out + b[None, :, None]

    y = x
    for blk in params["blocks"]:
        out1 = jax.nn.relu(conv(y, blk["conv1_w"], blk["conv1_b"],
                                blk["dilation"], blk["padding"]))
        out2 = jax.nn.relu(conv(out1, blk["conv2_w"], blk["conv2_b"],
                                blk["dilation"], blk["padding"]))
        res = y if "down_w" not in blk else conv(y, blk["down_w"], blk["down_b"], 1, 0)
        adj = jnp.einsum("bcl,nl->bcn", out2, blk["adj_w"]) + blk["adj_b"][None, None, :]
        y = jax.nn.relu(adj + res)
    yt = jnp.swapaxes(y, 1, 2)
    z = jnp.einsum("blc,hc->blh", yt, params["lin1_w"]) + params["lin1_b"]
    return jnp.swapaxes(z, 1, 2)


if __name__ == "__main__":
    B, lookback, horizon, num_vars = 2, 8, 4, 16
    num_channels = [25, 50]
    kernel_size = 2

    key = jax.random.PRNGKey(0)
    kp, kx = jax.random.split(key)
    params = init_tcn_params(kp, lookback, horizon, num_vars, num_channels, kernel_size)
    prepped = prepare_tcn_params(params, lookback, horizon, num_vars,
                                 num_channels, kernel_size, batch=B)
    x = jax.random.normal(kx, (B, lookback, num_vars), jnp.float32)

    # TODO(synk): dropout1/dropout2 use eval-mode (identity) semantics; training-mode
    # masks would require pltpu.prng_seed/prng_random_bits inside the fused kernel.
    out = tcn_forward(prepped, x)
    out = jax.block_until_ready(out)

    ref = ref_forward(params, x)
    assert out.shape == (B, horizon, num_vars), out.shape
    assert jnp.allclose(out, ref, atol=1e-4, rtol=1e-4), \
        float(jnp.max(jnp.abs(out - ref)))
    print("KERNEL_OK")
</pallas_src>

<mosaic_0001>
module attributes {stable_mosaic.version = 11 : i64} {
  func.func @_fused_tcn_kernel(%arg0: i32, %arg1: memref<8x32xf32, #tpu.memory_space<vmem>>, %arg2: memref<816x128xf32, #tpu.memory_space<vmem>>, %arg3: memref<4x32xf32, #tpu.memory_space<vmem>>) attributes {dimension_semantics = [#tpu.dimension_semantics<arbitrary>], iteration_bounds = array<i64: 1>, scalar_prefetch = 0 : i64, scratch_operands = 0 : i64, tpu.core_type = #tpu.core_type<tc>, window_params = [{pipeline_mode = #tpu.pipeline_mode<synchronous>, transform_indices = @transform_0, window_bounds = array<i64: 8, 32>}, {pipeline_mode = #tpu.pipeline_mode<synchronous>, transform_indices = @transform_1, window_bounds = array<i64: 816, 128>}, {pipeline_mode = #tpu.pipeline_mode<synchronous>, transform_indices = @transform_2, window_bounds = array<i64: 4, 32>}]} {
    %c0 = arith.constant 0 : index
    %c0_0 = arith.constant 0 : index
    %0 = vector.load %arg1[%c0, %c0_0] : memref<8x32xf32, #tpu.memory_space<vmem>>, vector<8x32xf32>
    %cst = arith.constant 0.000000e+00 : f32
    %1 = vector.broadcast %cst : f32 to vector<8x1xf32>
    %2 = vector.extract_strided_slice %0 {offsets = [0, 0], sizes = [8, 16], strides = [1, 1]} : vector<8x32xf32> to vector<8x16xf32>
    %3 = vector.extract_strided_slice %0 {offsets = [0, 16], sizes = [8, 16], strides = [1, 1]} : vector<8x32xf32> to vector<8x16xf32>
    %4 = tpu.concatenate %1, %2, %1, %3 in 1 : vector<8x1xf32>, vector<8x16xf32>, vector<8x1xf32>, vector<8x16xf32> -> vector<8x34xf32>
    %5 = tpu.concatenate %2, %1, %3, %1 in 1 : vector<8x16xf32>, vector<8x1xf32>, vector<8x16xf32>, vector<8x1xf32> -> vector<8x34xf32>
    %c0_1 = arith.constant 0 : index
    %c0_2 = arith.constant 0 : index
    %6 = vector.load %arg2[%c0_1, %c0_2] : memref<816x128xf32, #tpu.memory_space<vmem>>, vector<25x8xf32>
    %cst_3 = arith.constant dense<0.000000e+00> : vector<25x34xf32>
    %7 = tpu.matmul %6, %4, %cst_3 {dimension_numbers = #tpu.dot_dimension_numbers<[1], [0], [0], [1], [0, 0, 1, 1], [], []>} : vector<25x8xf32>, vector<8x34xf32>, vector<25x34xf32> -> vector<25x34xf32>
    %c32 = arith.constant 32 : index
    %c0_4 = arith.constant 0 : index
    %8 = vector.load %arg2[%c32, %c0_4] : memref<816x128xf32, #tpu.memory_space<vmem>>, vector<25x8xf32>
    %cst_5 = arith.constant dense<0.000000e+00> : vector<25x34xf32>
    %9 = tpu.matmul %8, %5, %cst_5 {dimension_numbers = #tpu.dot_dimension_numbers<[1], [0], [0], [1], [0, 0, 1, 1], [], []>} : vector<25x8xf32>, vector<8x34xf32>, vector<25x34xf32> -> vector<25x34xf32>
    %10 = arith.addf %7, %9 : vector<25x34xf32>
    %c64 = arith.constant 64 : index
    %c0_6 = arith.constant 0 : index
    %11 = vector.load %arg2[%c64, %c0_6] : memref<816x128xf32, #tpu.memory_space<vmem>>, vector<25x1xf32>
    %12 = vector.broadcast %11 : vector<25x1xf32> to vector<25x34xf32>
    %13 = arith.addf %10, %12 : vector<25x34xf32>
    %cst_7 = arith.constant 0.000000e+00 : f32
    %14 = vector.broadcast %cst_7 : f32 to vector<25x34xf32>
    %15 = arith.maximumf %13, %14 : vector<25x34xf32>
    %cst_8 = arith.constant 0.000000e+00 : f32
    %16 = vector.broadcast %cst_8 : f32 to vector<25x1xf32>
    %17 = vector.extract_strided_slice %15 {offsets = [0, 0], sizes = [25, 17], strides = [1, 1]} : vector<25x34xf32> to vector<25x17xf32>
    %18 = vector.extract_strided_slice %15 {offsets = [0, 17], sizes = [25, 17], strides = [1, 1]} : vector<25x34xf32> to vector<25x17xf32>
    %19 = tpu.concatenate %16, %17, %16, %18 in 1 : vector<25x1xf32>, vector<25x17xf32>, vector<25x1xf32>, vector<25x17xf32> -> vector<25x36xf32>
    %20 = tpu.concatenate %17, %16, %18, %16 in 1 : vector<25x17xf32>, vector<25x1xf32>, vector<25x17xf32>, vector<25x1xf32> -> vector<25x36xf32>
    %c96 = arith.constant 96 : index
    %c0_9 = arith.constant 0 : index
    %21 = vector.load %arg2[%c96, %c0_9] : memref<816x128xf32, #tpu.memory_space<vmem>>, vector<25x25xf32>
    %cst_10 = arith.constant dense<0.000000e+00> : vector<25x36xf32>
    %22 = tpu.matmul %21, %19, %cst_10 {dimension_numbers = #tpu.dot_dimension_numbers<[1], [0], [0], [1], [0, 0, 1, 1], [], []>} : vector<25x25xf32>, vector<25x36xf32>, vector<25x36xf32> -> vector<25x36xf32>
    %c128 = arith.constant 128 : index
    %c0_11 = arith.constant 0 : index
    %23 = vector.load %arg2[%c128, %c0_11] : memref<816x128xf32, #tpu.memory_space<vmem>>, vector<25x25xf32>
    %cst_12 = arith.constant dense<0.000000e+00> : vector<25x36xf32>
    %24 = tpu.matmul %23, %20, %cst_12 {dimension_numbers = #tpu.dot_dimension_numbers<[1], [0], [0], [1], [0, 0, 1, 1], [], []>} : vector<25x25xf32>, vector<25x36xf32>, vector<25x36xf32> -> vector<25x36xf32>
    %25 = arith.addf %22, %24 : vector<25x36xf32>
    %c160 = arith.constant 160 : index
    %c0_13 = arith.constant 0 : index
    %26 = vector.load %arg2[%c160, %c0_13] : memref<816x128xf32, #tpu.memory_space<vmem>>, vector<25x1xf32>
    %27 = vector.broadcast %26 : vector<25x1xf32> to vector<25x36xf32>
    %28 = arith.addf %25, %27 : vector<25x36xf32>
    %cst_14 = arith.constant 0.000000e+00 : f32
    %29 = vector.broadcast %cst_14 : f32 to vector<25x36xf32>
    %30 = arith.maximumf %28, %29 : vector<25x36xf32>
    %c192 = arith.constant 192 : index
    %c0_15 = arith.constant 0 : index
    %31 = vector.load %arg2[%c192, %c0_15] : memref<816x128xf32, #tpu.memory_space<vmem>>, vector<36x32xf32>
    %cst_16 = arith.constant dense<0.000000e+00> : vector<25x32xf32>
    %32 = tpu.matmul %30, %31, %cst_16 {dimension_numbers = #tpu.dot_dimension_numbers<[1], [0], [0], [1], [0, 0, 1, 1], [], []>} : vector<25x36xf32>, vector<36x32xf32>, vector<25x32xf32> -> vector<25x32xf32>
    %c232 = arith.constant 232 : index
    %c0_17 = arith.constant 0 : index
    %33 = vector.load %arg2[%c232, %c0_17] : memref<816x128xf32, #tpu.memory_space<vmem>>, vector<1x32xf32>
    %34 = vector.broadcast %33 : vector<1x32xf32> to vector<25x32xf32>
    %35 = arith.addf %32, %34 : vector<25x32xf32>
    %c240 = arith.constant 240 : index
    %c0_18 = arith.constant 0 : index
    %36 = vector.load %arg2[%c240, %c0_18] : memref<816x128xf32, #tpu.memory_space<vmem>>, vector<25x8xf32>
    %cst_19 = arith.constant dense<0.000000e+00> : vector<25x32xf32>
    %37 = tpu.matmul %36, %0, %cst_19 {dimension_numbers = #tpu.dot_dimension_numbers<[1], [0], [0], [1], [0, 0, 1, 1], [], []>} : vector<25x8xf32>, vector<8x32xf32>, vector<25x32xf32> -> vector<25x32xf32>
    %c272 = arith.constant 272 : index
    %c0_20 = arith.constant 0 : index
    %38 = vector.load %arg2[%c272, %c0_20] : memref<816x128xf32, #tpu.memory_space<vmem>>, vector<25x1xf32>
    %39 = vector.broadcast %38 : vector<25x1xf32> to vector<25x32xf32>
    %40 = arith.addf %37, %39 : vector<25x32xf32>
    %41 = arith.addf %35, %40 : vector<25x32xf32>
    %cst_21 = arith.constant 0.000000e+00 : f32
    %42 = vector.broadcast %cst_21 : f32 to vector<25x32xf32>
    %43 = arith.maximumf %41, %42 : vector<25x32xf32>
    %cst_22 = arith.constant 0.000000e+00 : f32
    %44 = vector.broadcast %cst_22 : f32 to vector<25x2xf32>
    %45 = vector.extract_strided_slice %43 {offsets = [0, 0], sizes = [25, 16], strides = [1, 1]} : vector<25x32xf32> to vector<25x16xf32>
    %46 = vector.extract_strided_slice %43 {offsets = [0, 16], sizes = [25, 16], strides = [1, 1]} : vector<25x32xf32> to vector<25x16xf32>
    %47 = tpu.concatenate %44, %45, %44, %46 in 1 : vector<25x2xf32>, vector<25x16xf32>, vector<25x2xf32>, vector<25x16xf32> -> vector<25x36xf32>
    %48 = tpu.concatenate %45, %44, %46, %44 in 1 : vector<25x16xf32>, vector<25x2xf32>, vector<25x16xf32>, vector<25x2xf32> -> vector<25x36xf32>
    %c304 = arith.constant 304 : index
    %c0_23 = arith.constant 0 : index
    %49 = vector.load %arg2[%c304, %c0_23] : memref<816x128xf32, #tpu.memory_space<vmem>>, vector<50x25xf32>
    %cst_24 = arith.constant dense<0.000000e+00> : vector<50x36xf32>
    %50 = tpu.matmul %49, %47, %cst_24 {dimension_numbers = #tpu.dot_dimension_numbers<[1], [0], [0], [1], [0, 0, 1, 1], [], []>} : vector<50x25xf32>, vector<25x36xf32>, vector<50x36xf32> -> vector<50x36xf32>
    %c360 = arith.constant 360 : index
    %c0_25 = arith.constant 0 : index
    %51 = vector.load %arg2[%c360, %c0_25] : memref<816x128xf32, #tpu.memory_space<vmem>>, vector<50x25xf32>
    %cst_26 = arith.constant dense<0.000000e+00> : vector<50x36xf32>
    %52 = tpu.matmul %51, %48, %cst_26 {dimension_numbers = #tpu.dot_dimension_numbers<[1], [0], [0], [1], [0, 0, 1, 1], [], []>} : vector<50x25xf32>, vector<25x36xf32>, vector<50x36xf32> -> vector<50x36xf32>
    %53 = arith.addf %50, %52 : vector<50x36xf32>
    %c416 = arith.constant 416 : index
    %c0_27 = arith.constant 0 : index
    %54 = vector.load %arg2[%c416, %c0_27] : memref<816x128xf32, #tpu.memory_space<vmem>>, vector<50x1xf32>
    %55 = vector.broadcast %54 : vector<50x1xf32> to vector<50x36xf32>
    %56 = arith.addf %53, %55 : vector<50x36xf32>
    %cst_28 = arith.constant 0.000000e+00 : f32
    %57 = vector.broadcast %cst_28 : f32 to vector<50x36xf32>
    %58 = arith.maximumf %56, %57 : vector<50x36xf32>
    %cst_29 = arith.constant 0.000000e+00 : f32
    %59 = vector.broadcast %cst_29 : f32 to vector<50x2xf32>
    %60 = vector.extract_strided_slice %58 {offsets = [0, 0], sizes = [50, 18], strides = [1, 1]} : vector<50x36xf32> to vector<50x18xf32>
    %61 = vector.extract_strided_slice %58 {offsets = [0, 18], sizes = [50, 18], strides = [1, 1]} : vector<50x36xf32> to vector<50x18xf32>
    %62 = tpu.concatenate %59, %60, %59, %61 in 1 : vector<50x2xf32>, vector<50x18xf32>, vector<50x2xf32>, vector<50x18xf32> -> vector<50x40xf32>
    %63 = tpu.concatenate %60, %59, %61, %59 in 1 : vector<50x18xf32>, vector<50x2xf32>, vector<50x18xf32>, vector<50x2xf32> -> vector<50x40xf32>
    %c472 = arith.constant 472 : index
    %c0_30 = arith.constant 0 : index
    %64 = vector.load %arg2[%c472, %c0_30] : memref<816x128xf32, #tpu.memory_space<vmem>>, vector<50x50xf32>
    %cst_31 = arith.constant dense<0.000000e+00> : vector<50x40xf32>
    %65 = tpu.matmul %64, %62, %cst_31 {dimension_numbers = #tpu.dot_dimension_numbers<[1], [0], [0], [1], [0, 0, 1, 1], [], []>} : vector<50x50xf32>, vector<50x40xf32>, vector<50x40xf32> -> vector<50x40xf32>
    %c528 = arith.constant 528 : index
    %c0_32 = arith.constant 0 : index
    %66 = vector.load %arg2[%c528, %c0_32] : memref<816x128xf32, #tpu.memory_space<vmem>>, vector<50x50xf32>
    %cst_33 = arith.constant dense<0.000000e+00> : vector<50x40xf32>
    %67 = tpu.matmul %66, %63, %cst_33 {dimension_numbers = #tpu.dot_dimension_numbers<[1], [0], [0], [1], [0, 0, 1, 1], [], []>} : vector<50x50xf32>, vector<50x40xf32>, vector<50x40xf32> -> vector<50x40xf32>
    %68 = arith.addf %65, %67 : vector<50x40xf32>
    %c584 = arith.constant 584 : index
    %c0_34 = arith.constant 0 : index
    %69 = vector.load %arg2[%c584, %c0_34] : memref<816x128xf32, #tpu.memory_space<vmem>>, vector<50x1xf32>
    %70 = vector.broadcast %69 : vector<50x1xf32> to vector<50x40xf32>
    %71 = arith.addf %68, %70 : vector<50x40xf32>
    %cst_35 = arith.constant 0.000000e+00 : f32
    %72 = vector.broadcast %cst_35 : f32 to vector<50x40xf32>
    %73 = arith.maximumf %71, %72 : vector<50x40xf32>
    %c640 = arith.constant 640 : index
    %c0_36 = arith.constant 0 : index
    %74 = vector.load %arg2[%c640, %c0_36] : memref<816x128xf32, #tpu.memory_space<vmem>>, vector<40x32xf32>
    %cst_37 = arith.constant dense<0.000000e+00> : vector<50x32xf32>
    %75 = tpu.matmul %73, %74, %cst_37 {dimension_numbers = #tpu.dot_dimension_numbers<[1], [0], [0], [1], [0, 0, 1, 1], [], []>} : vector<50x40xf32>, vector<40x32xf32>, vector<50x32xf32> -> vector<50x32xf32>
    %c680 = arith.constant 680 : index
    %c0_38 = arith.constant 0 : index
    %76 = vector.load %arg2[%c680, %c0_38] : memref<816x128xf32, #tpu.memory_space<vmem>>, vector<1x32xf32>
    %77 = vector.broadcast %76 : vector<1x32xf32> to vector<50x32xf32>
    %78 = arith.addf %75, %77 : vector<50x32xf32>
    %c688 = arith.constant 688 : index
    %c0_39 = arith.constant 0 : index
    %79 = vector.load %arg2[%c688, %c0_39] : memref<816x128xf32, #tpu.memory_space<vmem>>, vector<50x25xf32>
    %cst_40 = arith.constant dense<0.000000e+00> : vector<50x32xf32>
    %80 = tpu.matmul %79, %43, %cst_40 {dimension_numbers = #tpu.dot_dimension_numbers<[1], [0], [0], [1], [0, 0, 1, 1], [], []>} : vector<50x25xf32>, vector<25x32xf32>, vector<50x32xf32> -> vector<50x32xf32>
    %c744 = arith.constant 744 : index
    %c0_41 = arith.constant 0 : index
    %81 = vector.load %arg2[%c744, %c0_41] : memref<816x128xf32, #tpu.memory_space<vmem>>, vector<50x1xf32>
    %82 = vector.broadcast %81 : vector<50x1xf32> to vector<50x32xf32>
    %83 = arith.addf %80, %82 : vector<50x32xf32>
    %84 = arith.addf %78, %83 : vector<50x32xf32>
    %cst_42 = arith.constant 0.000000e+00 : f32
    %85 = vector.broadcast %cst_42 : f32 to vector<50x32xf32>
    %86 = arith.maximumf %84, %85 : vector<50x32xf32>
    %c800 = arith.constant 800 : index
    %c0_43 = arith.constant 0 : index
    %87 = vector.load %arg2[%c800, %c0_43] : memref<816x128xf32, #tpu.memory_space<vmem>>, vector<4x50xf32>
    %cst_44 = arith.constant dense<0.000000e+00> : vector<4x32xf32>
    %88 = tpu.matmul %87, %86, %cst_44 {dimension_numbers = #tpu.dot_dimension_numbers<[1], [0], [0], [1], [0, 0, 1, 1], [], []>} : vector<4x50xf32>, vector<50x32xf32>, vector<4x32xf32> -> vector<4x32xf32>
    %c808 = arith.constant 808 : index
    %c0_45 = arith.constant 0 : index
    %89 = vector.load %arg2[%c808, %c0_45] : memref<816x128xf32, #tpu.memory_space<vmem>>, vector<4x1xf32>
    %90 = vector.broadcast %89 : vector<4x1xf32> to vector<4x32xf32>
    %91 = arith.addf %88, %90 : vector<4x32xf32>
    %c0_46 = arith.constant 0 : index
    %c0_47 = arith.constant 0 : index
    %92 = vector.load %arg3[%c0_46, %c0_47] : memref<4x32xf32, #tpu.memory_space<vmem>>, vector<4x32xf32>
    tpu.vector_store %arg3[%c0_46, %c0_47], %91 {strides = array<i32>} : memref<4x32xf32, #tpu.memory_space<vmem>>, vector<4x32xf32>,
    return
  }
  func.func @transform_0(%arg0: i32) -> (i32, i32) {
    %c0_i32 = arith.constant 0 : i32
    %c0_i32_0 = arith.constant 0 : i32
    %c0_i32_1 = arith.constant 0 : i32
    return %c0_i32, %c0_i32_0 : i32, i32
  }
  func.func @transform_1(%arg0: i32) -> (i32, i32) {
    %c0_i32 = arith.constant 0 : i32
    %c0_i32_0 = arith.constant 0 : i32
    %c0_i32_1 = arith.constant 0 : i32
    return %c0_i32, %c0_i32_0 : i32, i32
  }
  func.func @transform_2(%arg0: i32) -> (i32, i32) {
    %c0_i32 = arith.constant 0 : i32
    %c0_i32_0 = arith.constant 0 : i32
    %c0_i32_1 = arith.constant 0 : i32
    return %c0_i32, %c0_i32_0 : i32, i32
  }
}

</mosaic_0001>

<bundles_post_ra>
// kernel: tpu_custom_call.1
= control target key start
LH: loop header
LB: loop body
LE: loop exit
PB: predicated region body
PF: predicated region fallthrough
CT: control target
= control target key end

     0   :  { %7 = vsyncpa [#allocation3], 0  ;;  %s3290_s0 = inlined_call_operand.hbm [shape: f32[8,32], index: 0, kind: input, shape index: {}]   ;;  %s3291_s1 = inlined_call_operand.hbm [shape: f32[816,128], index: 1, kind: input, shape index: {}]   ;;  %s3292_s2 = inlined_call_operand.hbm [shape: f32[4,32], index: 2, kind: output, shape index: {}]  }
   0x1   :  { %8 = vsyncpa [#allocation6], 0 }
   0x2   :  { %9 = vsyncpa [#allocation4], 0  ;;  %s2817_s9 = smov [#allocation2]   ;;  %s2818_s11 = smov [#allocation5]  }
   0x3   :  { %s16_s10 = sshll.u32 %s2817_s9, 4  ;;  %s25_s12 = sshll.u32 %s2818_s11, 4  ;;  %s17_s10 = int_to_ptr.vmem [resolvable:$true] %s16_s10  ;;  %s2845_s12 = int_to_ptr.vmem [resolvable:$true] %s25_s12 }
   0x4   :  { %s2745_s15 = scalar_lea.hbm %s3290_s0, 128 }
   0x5   :  { %p2746_p0 = scmp.ne.s32.totalorder %s3290_s0, %s2745_s15  ;;  %p2749_p1 = scmp.lt.u32.totalorder %s2745_s15, %s3290_s0 }
   0x7   :  { %p2751_p2 = pnand %p2749_p1, %p2746_p0 }
   0x9   :  { %2754 = shalt.err (!%p2751_p2)
}
   0xa   :  { %s2755_s20 = scalar_lea.vmem %s17_s10, 128  ;;  %p2760_p4 = scmp.lt.s32.totalorder %s17_s10, %s17_s10 }
   0xb   :  { %p2756_p3 = scmp.ne.s32.totalorder %s17_s10, %s2755_s20  ;;  %p2761_p5 = scmp.lt.s32.totalorder %s2755_s20, %s2755_s20 }
   0xd   :  { %p2762_p6 = por %p2761_p5, %p2760_p4 }
   0xf   :  { %p2763_p7 = pnand %p2762_p6, %p2756_p3 }
  0x11   :  { %2766 = shalt.err (!%p2763_p7)
}
  0x12   :  { %19 = dma.hbm_to_vmem [thread:$0]  %s3290_s0, 128, %s17_s10, [#allocation3]  }
  0x13   :  { %s2767_s25 = scalar_lea.hbm %s3291_s1, 13056 }
  0x14   :  { %p2768_p8 = scmp.ne.s32.totalorder %s3291_s1, %s2767_s25  ;;  %p2771_p9 = scmp.lt.u32.totalorder %s2767_s25, %s3291_s1 }
  0x16   :  { %p2773_p10 = pnand %p2771_p9, %p2768_p8 }
  0x18   :  { %2776 = shalt.err (!%p2773_p10)
}
  0x19   :  { %s2777_s30 = scalar_lea.vmem %s2845_s12, 13056  ;;  %p2782_p12 = scmp.lt.s32.totalorder %s2845_s12, %s2845_s12 }
  0x1a   :  { %p2778_p11 = scmp.ne.s32.totalorder %s2845_s12, %s2777_s30  ;;  %p2783_p13 = scmp.lt.s32.totalorder %s2777_s30, %s2777_s30 }
  0x1c   :  { %p2784_p0 = por %p2783_p13, %p2782_p12 }
  0x1e   :  { %p2785_p1 = pnand %p2784_p0, %p2778_p11 }
  0x20   :  { %2788 = shalt.err (!%p2785_p1)
}
  0x21   :  { %s2819_s0 = smov 128   ;;  %s2820_s3 = smov 8  }
  0x22   :  { %31 = dma.hbm_to_vmem [thread:$0]  %s3291_s1, 13056, %s2845_s12, [#allocation6], %s2819_s0, %s2819_s0, %s2820_s3  }
  0x23   :  { %2811 = dma.done.wait [#allocation3], 128  }
  0x24   :  { %2812 = vsyncadd [#allocation3], 4294967168 }
  0x25   :  { %2813 = dma.done.wait [#allocation6], 13056  }
  0x26   :  { %2814 = vsyncadd [#allocation6], 4294954240  ;;  %vm65_vm0 = vcmask 64512   ;;  %v2876_v0 = vld [vmem:[#allocation2] sm:$0xff]  ;;  %v61_v1 = vld [vmem:[#allocation5 + $0x20] sm:$0xff]  ;;  %s2821_s6 = smov 1  }
  0x27   :  { %40 = vrot.lane.b32.xlu0 %v2876_v0, %s2821_s6  ;;  %2252 = vmatprep.mubr.msk.f32.mxu0 %vm65_vm0, %v61_v1  ;;  %v260_v2 = vld [vmem:[#allocation5 + $0x40] sm:$0xff]  ;;  %v2822_v3 = vmov 0   ;;  %s2823_s7 = smov 2   ;;  %v261_v4 = vld [vmem:[#allocation5 + $0x48] sm:$0xff]  ;;  %v263_v5 = vld [vmem:[#allocation5 + $0x58] sm:$0x1] }
  0x28   :  { %2673 = vset.pattern.permute.xlu1 %v2822_v3  ;;  %2674 = vset.pattern.permute.xlu0 %v2822_v3  ;;  %v262_v6 = vld [vmem:[#allocation5 + $0x50] sm:$0xff]  ;;  %vm52_vm1 = vcmask 130048   ;;  %vm46_vm2 = vcmask 7168   ;;  %vm48_vm3 = vcmask 138240   ;;  %vm55_vm4 = vcmask 269312   ;;  %v62_v11 = vld [vmem:[#allocation5 + $0x28] sm:$0xff] }
  0x29   :  { %266 = vperm.xlu1 %2673, %v260_v2   ;;  %v53_v7 = vsel %vm52_vm1, %v2876_v0, 0.0  ;;  %vm50_vm5 = vcmask 146432   ;;  %v63_v12 = vld [vmem:[#allocation5 + $0x30] sm:$0xff]  ;;  %v64_v16 = vld [vmem:[#allocation5 + $0x38] sm:$0x1]  ;;  %v57_v17 = vld [vmem:[#allocation5] sm:$0xff] }
  0x2a   :  { %v58_v18 = vld [vmem:[#allocation5 + $0x8] sm:$0xff]  ;;  %v59_v19 = vld [vmem:[#allocation5 + $0x10] sm:$0xff]  ;;  %v60_v20 = vld [vmem:[#allocation5 + $0x18] sm:$0x1]  ;;  %vm354_vm6 = vcmask 203776   ;;  %vm341_vm7 = vcmask 285696  }
  0x2b   :  { %43 = vrot.lane.b32.xlu0 %v2876_v0, %s2823_s7  ;;  %v350_v37 = vld [vmem:[#allocation5 + $0x80] sm:$0xff]  ;;  %v558_v42 = vld [vmem:[#allocation5 + $0xb0] sm:$0xff]  ;;  %v557_v43 = vld [vmem:[#allocation5 + $0xa8] sm:$0xff]  ;;  %vm328_vm9 = vcmask 154624   ;;  %vm367_vm10 = vcmask 1040384   ;;  %vm2824_vm12 = vmmov 1  }
  0x2c   :  { %2274 = vmatprep.mubr.msk.f32.mxu1 %vm354_vm6, %v350_v37  ;;  %v556_v41 = vld [vmem:[#allocation5 + $0xa0] sm:$0xff]  ;;  %v704_v44 = vld [vmem:[#allocation5 + $0x110] sm:$0xff]  ;;  %v559_v45 = vld [vmem:[#allocation5 + $0xb8] sm:$0x1]  ;;  %vm611_vm14 = vcmask 1043456   ;;  %vm598_vm15 = vcmask 293888  }
  0x2d   :  { %271 = vperm.xlu1 %2673, %v261_v4   ;;  %v706_v46 = vld [vmem:[#allocation5 + $0x120] sm:$0xff]  ;;  %v705_v47 = vld [vmem:[#allocation5 + $0x118] sm:$0xff]  ;;  %v707_v48 = vld [vmem:[#allocation5 + $0x128] sm:$0x1]  ;;  %s2826_s1 = smov 4   ;;  %s2829_s8 = smov [#allocation7]  }
  0x2e   :  { %v588_v49 = vld [vmem:[#allocation5 + $0xc0] sm:$0xff]  ;;  %v589_v50 = vld [vmem:[#allocation5 + $0xc8] sm:$0xff]  ;;  %vm2907_vm8 = vmpackc.low %vm341_vm7, %vm341_vm7  ;;  %s2028_s9 = sshll.u32 %s2829_s8, 4  ;;  %s2029_s9 = int_to_ptr.vmem [resolvable:$true] %s2028_s9 }
  0x2f   :  { %281 = vperm.xlu0 %2674, %v263_v5   ;;  %v2545_v51 = vpack.c.bf16 %v589_v50, %v588_v49  ;;  %vm2530_vm11 = vmpackc.low %vm367_vm10, %vm341_vm7  ;;  %s2789_s10 = scalar_lea.vmem %s2029_s9, 64  ;;  %p2794_p3 = scmp.lt.s32.totalorder %s2029_s9, %s2029_s9 }
  0x30   :  { %vm2935_vm13 = vmpackc.low %vm367_vm10, %vm2824_vm12  ;;  %vm1313_vm12 = vcmask 408576   ;;  %p2790_p2 = scmp.ne.s32.totalorder %s2029_s9, %s2789_s10  ;;  %p2795_p4 = scmp.lt.s32.totalorder %s2789_s10, %s2789_s10 }
  0x31   :  { %276 = vperm.xlu1 %2673, %v262_v6  }
  0x32   :  { %p2796_p5 = por %p2795_p4, %p2794_p3 }
  0x34   :  { %p2797_p6 = pnand %p2796_p5, %p2790_p2 }
  0x99   :  { %v41_v8 = vpop.permute.xlu0 %40 }
  0x9a   :  { %v47_v9 = vsel %vm46_vm2, 0.0, %v41_v8  ;;  %v54_v10 = vsel %vm48_vm3, %v53_v7, %v41_v8 }
  0x9b   :  { %2250 = vmatprep.subr.msk.mxu0 %vm55_vm4, %v54_v10  ;;  %v49_v13 = vsel %vm48_vm3, %v47_v9, 0.0 }
  0x9c   :  { %2251 = vmatpush3.msk.msra.mxu0 %vm55_vm4, %v54_v10  ;;  %vm870_vm4 = vcmask 162816  }
  0x9d   :  { %v44_v14 = vpop.permute.xlu0 %43  ;;  %2253 = vmatmul.mubr.msk.f32.vlgmr.msra.gmra.mrb[0].mxu0 %vm65_vm0, %v62_v11 }
  0x9e   :  { %v51_v15 = vsel %vm50_vm5, %v49_v13, %v44_v14  ;;  %2255 = vmatprep.mubr.msk.f32.mxu0 %vm65_vm0, %v63_v12 }
  0x9f   :  { %2258 = vmatprep.subr.mxu0 %v51_v15 }
  0xa0   :  { %2259 = vmatpush3.msra.mxu0 %v51_v15 }
  0xa1   :  { %2256 = vmatmul.mubr.msk.f32.gmra.mrb[2].mxu0 %vm65_vm0, %v64_v16  ;;  %2546 = vmatprep.subr.bf16.mxu0 %v2545_v51 }
  0xa2   :  { %2260 = vmatprep.mubr.msk.f32.mxu0 %vm65_vm0, %v57_v17 }
  0xa5   :  { %2261 = vmatmul.mubr.msk.f32.vlgmr.msra.gmra.mrb[0].mxu0 %vm65_vm0, %v58_v18 }
  0xa6   :  { %2263 = vmatprep.mubr.msk.f32.mxu0 %vm65_vm0, %v59_v19  ;;  %2548 = vmatpush3.bf16.msra.mxu0 %v2545_v51 }
  0xa8   :  { %v267_v21 = vpop.permute.xlu1 %266 }
  0xa9   :  { %2264 = vmatmul.mubr.msk.f32.gmra.mrb[2].mxu0 %vm65_vm0, %v60_v20 }
  0xac   :  { %v272_v22 = vpop.permute.xlu1 %271 }
  0xae   :  { %v282_v27 = vpop.permute.xlu0 %281 }
  0xb0   :  { %v277_v31 = vpop.permute.xlu1 %276 }
 0x178   :  { %v2262_v23 = vpop.f32.mrb[0].mxu0 }
 0x179   :  { %v285_v24 = vadd.f32 %v2262_v23, %v272_v22  ;;  %v241_v25 = vpop.f32.mrb[1].mxu0 }
 0x17a   :  { %v284_v26 = vadd.f32 %v267_v21, %v241_v25 }
 0x17b   :  { %v289_v28 = vmax.f32 %v285_v24, 0.0 }
 0x17c   :  { %v288_v29 = vmax.f32 %v284_v26, 0.0  ;;  %v2265_v30 = vpop.f32.mrb[2].mxu0  ;;  %v351_v26 = vld [vmem:[#allocation5 + $0x88] sm:$0xff] }
 0x17d   :  { %v287_v32 = vadd.f32 %v2265_v30, %v282_v27  ;;  %v251_v33 = vpop.f32.mrb[3].mxu0  ;;  %v334_v56 = vsel %vm48_vm3, %v289_v28, 0.0  ;;  %v352_v27 = vld [vmem:[#allocation5 + $0x90] sm:$0xff]  ;;  %v353_v30 = vld [vmem:[#allocation5 + $0x98] sm:$0x1] }
 0x17e   :  { %v286_v34 = vadd.f32 %v277_v31, %v251_v33  ;;  %v2675_v35 = vpack.i.bf16 %v289_v28, %v288_v29  ;;  %v333_v55 = vsel %vm48_vm3, %v288_v29, 0.0  ;;  %v346_v31 = vld [vmem:[#allocation5 + $0x60] sm:$0xff]  ;;  %v348_v33 = vld [vmem:[#allocation5 + $0x70] sm:$0xff]  ;;  %v1754_v28 = vld [vmem:[#allocation5 + $0x2c8] sm:$0xff] }
 0x17f   :  { %v291_v36 = vmax.f32 %v287_v32, 0.0  ;;  %v347_v32 = vld [vmem:[#allocation5 + $0x68] sm:$0xff] }
 0x180   :  { %v290_v38 = vmax.f32 %v286_v34, 0.0  ;;  %2676 = vrot.lane.b32.xlu1 %v2675_v35, %s2821_s6  ;;  %v349_v34 = vld [vmem:[#allocation5 + $0x78] sm:$0x1] }
 0x181   :  { %v336_v6 = vsel %vm48_vm3, %v291_v36, 0.0 }
 0x182   :  { %v2680_v39 = vpack.i.bf16 %v290_v38, %v291_v36  ;;  %v2690_v40 = vpack.i.bf16 %v291_v36, %v290_v38  ;;  %v335_v7 = vsel %vm48_vm3, %v290_v38, 0.0  ;;  %v591_v36 = vld [vmem:[#allocation5 + $0xd8] sm:$0xff]  ;;  %v592_v38 = vld [vmem:[#allocation5 + $0xe0] sm:$0xf]  ;;  %vm883_vm3 = vcmask 277504  }
 0x184   :  { %2686 = vrot.lane.b32.xlu1 %v2675_v35, %s2823_s7  ;;  %2681 = vrot.lane.b32.xlu0 %v2680_v39, %s2821_s6  ;;  %v590_v35 = vld [vmem:[#allocation5 + $0xd0] sm:$0xff] }
 0x185   :  { %v2549_v37 = vpack.c.bf16 %v591_v36, %v590_v35 }
 0x187   :  { %2550 = vmatprep.subr.bf16.mxu0 %v2549_v37 }
 0x188   :  { %562 = vperm.xlu1 %2673, %v556_v41   ;;  %2691 = vrot.lane.b32.xlu0 %v2690_v40, %s2823_s7 }
 0x189   :  { %2552 = vmatpush3.bf16.msra.mxu0 %v2549_v37 }
 0x18a   :  { %2302 = vmatprep.subr.msk.mxu0 %vm611_vm14, %v592_v38 }
 0x18c   :  { %572 = vperm.xlu1 %2673, %v558_v42   ;;  %567 = vperm.xlu0 %2674, %v557_v43  }
 0x18d   :  { %2303 = vmatpush3.msk.msra.mxu0 %vm611_vm14, %v592_v38 }
 0x18e   :  { %2310 = vmatprep.subr.mxu0 %v2876_v0 }
 0x190   :  { %710 = vperm.xlu1 %2673, %v704_v44   ;;  %577 = vperm.xlu0 %2674, %v559_v45  }
 0x194   :  { %720 = vperm.xlu1 %2673, %v706_v46   ;;  %715 = vperm.xlu0 %2674, %v705_v47  }
 0x198   :  { %725 = vperm.xlu0 %2674, %v707_v48  }
 0x1f2   :  { %v2677_v52 = vpop.permute.xlu1 %2676 }
 0x1f3   :  { %v2679_v53 = vunpack.i.h.bf16 %v2677_v52  ;;  %v2678_v54 = vunpack.i.l.bf16 %v2677_v52 }
 0x1f5   :  { %v337_v57 = vsel %vm50_vm5, %v333_v55, %v2678_v54  ;;  %v338_v58 = vsel %vm50_vm5, %v334_v56, %v2679_v53  ;;  %v321_v60 = vsel %vm46_vm2, 0.0, %v2679_v53  ;;  %v320_v61 = vsel %vm46_vm2, 0.0, %v2678_v54  ;;  %v700_v55 = vld [vmem:[#allocation5 + $0xf0] sm:$0xff]  ;;  %v701_v56 = vld [vmem:[#allocation5 + $0xf8] sm:$0xff] }
 0x1f6   :  { %v2687_v62 = vpop.permute.xlu1 %2686  ;;  %v2682_v63 = vpop.permute.xlu0 %2681  ;;  %v2523_v1 = vpack.c.bf16 %v338_v58, %v337_v57  ;;  %v325_v8 = vsel %vm50_vm5, %v321_v60, 0.0  ;;  %v324_v9 = vsel %vm50_vm5, %v320_v61, 0.0  ;;  %v702_v57 = vld [vmem:[#allocation5 + $0x100] sm:$0xff]  ;;  %v703_v58 = vld [vmem:[#allocation5 + $0x108] sm:$0x1] }
 0x1f7   :  { %v2689_v2 = vunpack.i.h.bf16 %v2687_v62  ;;  %v2688_v3 = vunpack.i.l.bf16 %v2687_v62  ;;  %v2684_v4 = vunpack.i.h.bf16 %v2682_v63  ;;  %v2683_v5 = vunpack.i.l.bf16 %v2682_v63 }
 0x1f8   :  { %2525 = vmatprep.subr.msk.bf16.mxu1 %vm2907_vm8, %v2523_v1 }
 0x1f9   :  { %v339_v10 = vsel %vm50_vm5, %v335_v7, %v2684_v4  ;;  %v340_v11 = vsel %vm50_vm5, %v336_v6, %v2683_v5  ;;  %2528 = vmatpush3.bf16.msk.msra.mxu1 %vm2907_vm8, %v2523_v1  ;;  %v322_v12 = vsel %vm46_vm2, 0.0, %v2684_v4  ;;  %v323_v13 = vsel %vm46_vm2, 0.0, %v2683_v5 }
 0x1fa   :  { %v345_v14 = vsel %vm341_vm7, %v340_v11, 0.0  ;;  %v2692_v15 = vpop.permute.xlu0 %2691  ;;  %v329_v16 = vsel %vm328_vm9, %v324_v9, %v2688_v3  ;;  %v330_v20 = vsel %vm328_vm9, %v325_v8, %v2689_v2  ;;  %v326_v21 = vsel %vm50_vm5, %v322_v12, 0.0  ;;  %vm2555_vm7 = vmpackc.low %vm883_vm3, %vm883_vm3 }
 0x1fb   :  { %v2529_v17 = vpack.c.bf16 %v345_v14, %v339_v10  ;;  %v2694_v18 = vunpack.i.h.bf16 %v2692_v15  ;;  %v2693_v19 = vunpack.i.l.bf16 %v2692_v15  ;;  %v327_v22 = vsel %vm50_vm5, %v323_v13, 0.0 }
 0x1fc   :  { %v2535_v23 = vpack.c.bf16 %v330_v20, %v329_v16  ;;  %v2825_v5 = vmov 0.0|0.0   ;;  %vm861_vm2 = vcmask 15360   ;;  %vm1291_vm8 = vcmask 310272  }
 0x1fd   :  { %2531 = vmatprep.subr.msk.bf16.mxu1 %vm2530_vm11, %v2529_v17  ;;  %v331_v24 = vsel %vm328_vm9, %v326_v21, %v2693_v19  ;;  %v332_v25 = vsel %vm328_vm9, %v327_v22, %v2694_v18  ;;  %v2828_v19 = vmov 0.0   ;;  %v1151_v22 = vld [vmem:[#allocation5 + $0x1a8] sm:$0xff]  ;;  %vm1269_vm9 = vcmask 179200  }
 0x1fe   :  { %2534 = vmatpush3.bf16.msk.msra.mxu1 %vm2530_vm11, %v2529_v17  ;;  %v2539_v29 = vpack.c.bf16 %v332_v25, %v331_v24  ;;  %v1153_v24 = vld [vmem:[#allocation5 + $0x1b8] sm:$0xff]  ;;  %v1152_v25 = vld [vmem:[#allocation5 + $0x1b0] sm:$0xff]  ;;  %vm1335_vm11 = vcmask 1041408  }
 0x1ff   :  { %2536 = vmatprep.subr.bf16.mxu1 %v2535_v23 }
 0x201   :  { %2275 = vmatmul.mubr.msk.f32.vlgmr.msra.gmra.mrb[0].mxu1 %vm354_vm6, %v351_v26  ;;  %v1155_v26 = vld [vmem:[#allocation5 + $0x1c8] sm:$0xff] }
 0x202   :  { %2538 = vmatpush3.bf16.msra.mxu1 %v2535_v23  ;;  %2277 = vmatprep.mubr.msk.f32.mxu1 %vm354_vm6, %v352_v27  ;;  %v1150_v23 = vld [vmem:[#allocation5 + $0x1a0] sm:$0xff] }
 0x203   :  { %2541 = vmatprep.subr.msk.bf16.mxu1 %vm2935_vm13, %v2539_v29  ;;  %v1154_v27 = vld [vmem:[#allocation5 + $0x1c0] sm:$0xff] }
 0x205   :  { %2278 = vmatmul.mubr.msk.f32.gmra.mrb[2].mxu1 %vm354_vm6, %v353_v30 }
 0x206   :  { %2544 = vmatpush3.bf16.msk.msra.mxu1 %vm2935_vm13, %v2539_v29  ;;  %2288 = vmatprep.mubr.msk.f32.mxu1 %vm354_vm6, %v346_v31  ;;  %v1156_v29 = vld [vmem:[#allocation5 + $0x1d0] sm:$0x3] }
 0x207   :  { %v563_v40 = vpop.permute.xlu1 %562  ;;  %2553 = vmatprep.subr.bf16.mxu1 %v2825_v5 }
 0x209   :  { %2289 = vmatmul.mubr.msk.f32.vlgmr.msra.gmra.mrb[0].mxu1 %vm354_vm6, %v347_v32 }
 0x20a   :  { %2291 = vmatprep.mubr.msk.f32.mxu1 %vm354_vm6, %v348_v33 }
 0x20b   :  { %v568_v39 = vpop.permute.xlu0 %567  ;;  %v573_v48 = vpop.permute.xlu1 %572 }
 0x20d   :  { %2292 = vmatmul.mubr.msk.f32.gmra.mrb[2].mxu1 %vm354_vm6, %v349_v34 }
 0x20f   :  { %v578_v45 = vpop.permute.xlu0 %577  ;;  %v711_v60 = vpop.permute.xlu1 %710 }
 0x213   :  { %v716_v59 = vpop.permute.xlu0 %715  ;;  %v721_v2 = vpop.permute.xlu1 %720 }
 0x217   :  { %v726_v63 = vpop.permute.xlu0 %725 }
 0x2dc   :  { %v2290_v41 = vpop.f32.mrb[0].mxu1 }
 0x2dd   :  { %v581_v42 = vadd.f32 %v2290_v41, %v568_v39  ;;  %v537_v43 = vpop.f32.mrb[1].mxu1 }
 0x2de   :  { %v580_v44 = vadd.f32 %v563_v40, %v537_v43 }
 0x2df   :  { %v585_v49 = vmax.f32 %v581_v42, 0.0 }
 0x2e0   :  { %v584_v46 = vmax.f32 %v580_v44, 0.0  ;;  %v2293_v47 = vpop.f32.mrb[2].mxu1 }
 0x2e1   :  { %v583_v50 = vadd.f32 %v2293_v47, %v578_v45  ;;  %v547_v51 = vpop.f32.mrb[3].mxu1 }
 0x2e2   :  { %v582_v52 = vadd.f32 %v573_v48, %v547_v51  ;;  %2304 = vmatprep.mubr.msk.f32.mxu0 %vm598_vm15, %v584_v46 }
 0x2e3   :  { %2305 = vmatmul.mubr.msk.f32.vlgmr.msra.gmra.mrb[4].mxu0 %vm598_vm15, %v585_v49  ;;  %v587_v54 = vmax.f32 %v583_v50, 0.0 }
 0x2e4   :  { %v586_v53 = vmax.f32 %v582_v52, 0.0  ;;  %2311 = vmatpush3.msra.mxu0 %v2876_v0  ;;  %v2060_v0 = vld [vmem:[#allocation5 + $0xe8] ss:$0 sm:$0xff] }
 0x2e5   :  { %v2617_v61 = vadd.f32 %v2060_v0, %v716_v59  ;;  %v2619_v62 = vadd.f32 %v2060_v0, %v711_v60  ;;  %2561 = vmatprep.subr.bf16.mxu0 %v2825_v5  ;;  %v2621_v7 = vadd.f32 %v2060_v0, %v726_v63  ;;  %v2623_v9 = vadd.f32 %v2060_v0, %v721_v2 }
 0x2e6   :  { %2307 = vmatprep.mubr.msk.f32.mxu0 %vm598_vm15, %v586_v53 }
 0x2e7   :  { %2308 = vmatmul.mubr.msk.f32.gmra.mrb[6].mxu0 %vm598_vm15, %v587_v54 }
 0x2e8   :  { %2312 = vmatprep.mubr.msk.f32.mxu0 %vm65_vm0, %v700_v55 }
 0x2eb   :  { %2313 = vmatmul.mubr.msk.f32.vlgmr.msra.gmra.mrb[4].mxu0 %vm65_vm0, %v701_v56 }
 0x2ec   :  { %2315 = vmatprep.mubr.msk.f32.mxu0 %vm65_vm0, %v702_v57 }
 0x2ef   :  { %2316 = vmatmul.mubr.msk.f32.gmra.mrb[6].mxu0 %vm65_vm0, %v703_v58  ;;  %vm2827_vm0 = vmmov 0  }
 0x2f0   :  { %2326 = vmatprep.mubr.msk.f32.mxu1 %vm2827_vm0, %v2828_v19  ;;  %2355 = vmatprep.mubr.msk.f32.mxu0 %vm2827_vm0, %v2828_v19 }
 0x3be   :  { %v2314_v1 = vpop.f32.mrb[4].mxu0 }
 0x3bf   :  { %v2618_v3 = vadd.f32 %v2617_v61, %v2314_v1  ;;  %v806_v4 = vpop.f32.mrb[5].mxu0 }
 0x3c0   :  { %v2620_v6 = vadd.f32 %v2619_v62, %v806_v4  ;;  %v888_v4 = vld [vmem:[#allocation5 + $0x130] sm:$0xff] }
 0x3c1   :  { %v2962_v8 = vmax.f32 %v2618_v3, 0.0  ;;  %v895_v3 = vld [vmem:[#allocation5 + $0x168] sm:$0xff] }
 0x3c2   :  { %v2964_v10 = vmax.f32 %v2620_v6, 0.0  ;;  %v2317_v11 = vpop.f32.mrb[6].mxu0  ;;  %v896_v6 = vld [vmem:[#allocation5 + $0x170] sm:$0xff] }
 0x3c3   :  { %v2622_v12 = vadd.f32 %v2621_v7, %v2317_v11  ;;  %v816_v13 = vpop.f32.mrb[7].mxu0  ;;  %v876_v36 = vsel %vm52_vm1, %v2962_v8, 0.0  ;;  %v889_v7 = vld [vmem:[#allocation5 + $0x138] sm:$0xff]  ;;  %v890_v11 = vld [vmem:[#allocation5 + $0x140] sm:$0xff] }
 0x3c4   :  { %v2624_v14 = vadd.f32 %v2623_v9, %v816_v13  ;;  %v2700_v15 = vpack.i.bf16 %v2962_v8, %v2964_v10  ;;  %v2596_v17 = vpack.c.bf16 %v2962_v8, %v2964_v10  ;;  %v875_v37 = vsel %vm52_vm1, %v2964_v10, 0.0  ;;  %v897_v9 = vld [vmem:[#allocation5 + $0x178] sm:$0xff]  ;;  %v891_v13 = vld [vmem:[#allocation5 + $0x148] sm:$0xff]  ;;  %v1753_v10 = vld [vmem:[#allocation5 + $0x2c0] sm:$0xff] }
 0x3c5   :  { %v2968_v16 = vmax.f32 %v2622_v12, 0.0  ;;  %v898_v12 = vld [vmem:[#allocation5 + $0x180] sm:$0xff]  ;;  %v1752_v8 = vld [vmem:[#allocation5 + $0x2b8] sm:$0xff] }
 0x3c6   :  { %v2972_v18 = vmax.f32 %v2624_v14, 0.0  ;;  %2701 = vrot.lane.b32.xlu0 %v2700_v15, %s2826_s1  ;;  %2696 = vrot.lane.b32.xlu1 %v2700_v15, %s2823_s7  ;;  %v899_v14 = vld [vmem:[#allocation5 + $0x188] sm:$0xff]  ;;  %v892_v15 = vld [vmem:[#allocation5 + $0x150] sm:$0xff] }
 0x3c7   :  { %v878_v54 = vsel %vm52_vm1, %v2968_v16, 0.0 }
 0x3c8   :  { %v2599_v20 = vpack.c.bf16 %v2968_v16, %v2972_v18  ;;  %v2710_v21 = vpack.i.bf16 %v2968_v16, %v2972_v18  ;;  %v877_v55 = vsel %vm52_vm1, %v2972_v18, 0.0  ;;  %vm2559_vm1 = vmpackc.low %vm367_vm10, %vm883_vm3  ;;  %v1755_v16 = vld [vmem:[#allocation5 + $0x2d0] sm:$0xff]  ;;  %v1757_v18 = vld [vmem:[#allocation5 + $0x2e0] sm:$0x3] }
 0x3c9   :  { %vm3117_vm10 = vmpackc.low %vm1291_vm8, %vm1291_vm8 }
 0x3ca   :  { %2711 = vrot.lane.b32.xlu0 %v2710_v21, %s2826_s1  ;;  %2706 = vrot.lane.b32.xlu1 %v2710_v21, %s2823_s7  ;;  %v900_v21 = vld [vmem:[#allocation5 + $0x190] sm:$0xff] }
 0x3ce   :  { %1164 = vperm.xlu0 %2674, %v1151_v22   ;;  %1159 = vperm.xlu1 %2673, %v1150_v23   ;;  %v893_v22 = vld [vmem:[#allocation5 + $0x158] sm:$0xff] }
 0x3cf   :  { %v901_v23 = vld [vmem:[#allocation5 + $0x198] sm:$0x3] }
 0x3d2   :  { %1174 = vperm.xlu0 %2674, %v1153_v24   ;;  %1169 = vperm.xlu1 %2673, %v1152_v25   ;;  %v894_v24 = vld [vmem:[#allocation5 + $0x160] sm:$0x3] }
 0x3d6   :  { %1184 = vperm.xlu0 %2674, %v1155_v26   ;;  %1179 = vperm.xlu1 %2673, %v1154_v27  }
 0x3da   :  { %1189 = vperm.xlu1 %2673, %v1156_v29  }
 0x438   :  { %v2702_v30 = vpop.permute.xlu0 %2701  ;;  %v2697_v31 = vpop.permute.xlu1 %2696 }
 0x439   :  { %v2699_v32 = vunpack.i.h.bf16 %v2697_v31  ;;  %v2698_v33 = vunpack.i.l.bf16 %v2697_v31  ;;  %v2704_v34 = vunpack.i.h.bf16 %v2702_v30  ;;  %v2703_v35 = vunpack.i.l.bf16 %v2702_v30 }
 0x43b   :  { %v863_v38 = vsel %vm861_vm2, 0.0, %v2699_v32  ;;  %v880_v39 = vsel %vm50_vm5, %v876_v36, %v2699_v32  ;;  %v862_v40 = vsel %vm861_vm2, 0.0, %v2698_v33  ;;  %v879_v41 = vsel %vm50_vm5, %v875_v37, %v2698_v33 }
 0x43c   :  { %v867_v42 = vsel %vm50_vm5, %v863_v38, 0.0  ;;  %v866_v43 = vsel %vm50_vm5, %v862_v40, 0.0  ;;  %v2554_v44 = vpack.c.bf16 %v880_v39, %v879_v41  ;;  %v2712_v45 = vpop.permute.xlu0 %2711  ;;  %v2707_v46 = vpop.permute.xlu1 %2706 }
 0x43d   :  { %v872_v47 = vsel %vm870_vm4, %v867_v42, %v2704_v34  ;;  %v871_v48 = vsel %vm870_vm4, %v866_v43, %v2703_v35  ;;  %v2709_v49 = vunpack.i.h.bf16 %v2707_v46  ;;  %v2708_v50 = vunpack.i.l.bf16 %v2707_v46 }
 0x43e   :  { %2556 = vmatpush3.bf16.msk.msra.mxu1 %vm2555_vm7, %v2554_v44  ;;  %v2562_v51 = vpack.c.bf16 %v872_v47, %v871_v48  ;;  %v2714_v52 = vunpack.i.h.bf16 %v2712_v45  ;;  %v2713_v53 = vunpack.i.l.bf16 %v2712_v45 }
 0x43f   :  { %2557 = vmatprep.subr.bf16.mxu1 %v2825_v5  ;;  %v865_v56 = vsel %vm861_vm2, 0.0, %v2709_v49  ;;  %v882_v57 = vsel %vm50_vm5, %v878_v54, %v2709_v49  ;;  %v864_v58 = vsel %vm861_vm2, 0.0, %v2708_v50  ;;  %v881_v59 = vsel %vm50_vm5, %v877_v55, %v2708_v50 }
 0x440   :  { %2563 = vmatpush3.bf16.msra.mxu0 %v2562_v51  ;;  %v869_v60 = vsel %vm50_vm5, %v865_v56, 0.0  ;;  %v887_v0 = vsel %vm883_vm3, %v882_v57, 0.0  ;;  %v868_v61 = vsel %vm50_vm5, %v864_v58, 0.0 }
 0x441   :  { %2564 = vmatprep.subr.bf16.mxu0 %v2825_v5  ;;  %v874_v62 = vsel %vm870_vm4, %v869_v60, %v2714_v52  ;;  %v873_v63 = vsel %vm870_vm4, %v868_v61, %v2713_v53  ;;  %v2558_v1 = vpack.c.bf16 %v887_v0, %v881_v59 }
 0x442   :  { %v2565_v2 = vpack.c.bf16 %v874_v62, %v873_v63 }
 0x443   :  { %2560 = vmatpush3.bf16.msk.msra.mxu1 %vm2559_vm1, %v2558_v1 }
 0x444   :  { %2567 = vmatpush3.bf16.msk.msra.mxu0 %vm2935_vm13, %v2565_v2  ;;  %2568 = vmatprep.subr.bf16.mxu1 %v2825_v5 }
 0x445   :  { %2580 = vmatprep.subr.bf16.mxu0 %v2825_v5 }
 0x446   :  { %2327 = vmatmul.mubr.msk.f32.vlgmr.msra.gmra.mrb[4].mxu1 %vm354_vm6, %v895_v3 }
 0x447   :  { %2356 = vmatmul.mubr.msk.f32.vlgmr.msra.gmra.mrb[8].mxu0 %vm354_vm6, %v888_v4  ;;  %2329 = vmatprep.mubr.msk.f32.mxu1 %vm2827_vm0, %v2828_v19 }
 0x448   :  { %2358 = vmatprep.mubr.msk.f32.mxu0 %vm2827_vm0, %v2828_v19 }
 0x44a   :  { %2330 = vmatmul.mubr.msk.f32.gmra.mrb[6].mxu1 %vm354_vm6, %v896_v6 }
 0x44b   :  { %2359 = vmatmul.mubr.msk.f32.gmra.mrb[10].mxu0 %vm354_vm6, %v889_v7  ;;  %2332 = vmatprep.mubr.msk.f32.mxu1 %vm2827_vm0, %v2828_v19 }
 0x44c   :  { %2361 = vmatprep.mubr.msk.f32.mxu0 %vm2827_vm0, %v2828_v19 }
 0x44d   :  { %v1160_v31 = vpop.permute.xlu1 %1159  ;;  %v1165_v38 = vpop.permute.xlu0 %1164 }
 0x44e   :  { %2333 = vmatmul.mubr.msk.f32.gmra.mrb[8].mxu1 %vm354_vm6, %v897_v9 }
 0x44f   :  { %2362 = vmatmul.mubr.msk.f32.gmra.mrb[12].mxu0 %vm354_vm6, %v890_v11  ;;  %2335 = vmatprep.mubr.msk.f32.mxu1 %vm2827_vm0, %v2828_v19 }
 0x450   :  { %2364 = vmatprep.mubr.msk.f32.mxu0 %vm2827_vm0, %v2828_v19 }
 0x451   :  { %v1170_v47 = vpop.permute.xlu1 %1169  ;;  %v1175_v55 = vpop.permute.xlu0 %1174 }
 0x452   :  { %2336 = vmatmul.mubr.msk.f32.gmra.mrb[10].mxu1 %vm354_vm6, %v898_v12 }
 0x453   :  { %2365 = vmatmul.mubr.msk.f32.gmra.mrb[14].mxu0 %vm354_vm6, %v891_v13  ;;  %2338 = vmatprep.mubr.msk.f32.mxu1 %vm2827_vm0, %v2828_v19 }
 0x454   :  { %2367 = vmatprep.mubr.msk.f32.mxu0 %vm2827_vm0, %v2828_v19 }
 0x455   :  { %v1180_v63 = vpop.permute.xlu1 %1179  ;;  %v1185_v11 = vpop.permute.xlu0 %1184 }
 0x456   :  { %2339 = vmatmul.mubr.msk.f32.gmra.mrb[12].mxu1 %vm354_vm6, %v899_v14 }
 0x457   :  { %2368 = vmatmul.mubr.msk.f32.gmra.mrb[16].mxu0 %vm354_vm6, %v892_v15  ;;  %2341 = vmatprep.mubr.msk.f32.mxu1 %vm2827_vm0, %v2828_v19 }
 0x458   :  { %2370 = vmatprep.mubr.msk.f32.mxu0 %vm2827_vm0, %v2828_v19 }
 0x45a   :  { %2342 = vmatmul.mubr.msk.f32.gmra.mrb[14].mxu1 %vm354_vm6, %v900_v21 }
 0x45b   :  { %2371 = vmatmul.mubr.msk.f32.gmra.mrb[18].mxu0 %vm354_vm6, %v893_v22  ;;  %2344 = vmatprep.mubr.msk.f32.mxu1 %vm2827_vm0, %v2828_v19 }
 0x45c   :  { %2373 = vmatprep.mubr.msk.f32.mxu0 %vm2827_vm0, %v2828_v19 }
 0x45e   :  { %2345 = vmatmul.mubr.msk.f32.gmra.mrb[16].mxu1 %vm354_vm6, %v901_v23 }
 0x45f   :  { %2374 = vmatmul.mubr.msk.f32.gmra.mrb[20].mxu0 %vm354_vm6, %v894_v24  ;;  %2390 = vmatprep.mubr.msk.f32.mxu1 %vm2827_vm0, %v2828_v19 }
 0x460   :  { %2425 = vmatprep.mubr.msk.f32.mxu0 %vm2827_vm0, %v2828_v19 }
 0x519   :  { %v992_v25 = vpop.f32.mrb[4].mxu1 }
 0x51a   :  { %v2328_v26 = vpop.f32.mrb[5].mxu1  ;;  %v1116_v27 = vpop.f32.mrb[8].mxu0 }
 0x51b   :  { %v1117_v29 = vadd.f32 %v1116_v27, %v992_v25  ;;  %v2357_v30 = vpop.f32.mrb[9].mxu0  ;;  %v1190_v25 = vpop.permute.xlu1 %1189 }
 0x51c   :  { %v1569_v30 = vld [vmem:[#allocation5 + $0x278] sm:$0x3] }
 0x51d   :  { %v997_v32 = vpop.f32.mrb[6].mxu1  ;;  %v3063_v35 = vadd.f32 %v1160_v31, %v1117_v29  ;;  %v1568_v31 = vld [vmem:[#allocation5 + $0x270] sm:$0xff] }
 0x51e   :  { %v2331_v33 = vpop.f32.mrb[7].mxu1  ;;  %v1121_v34 = vpop.f32.mrb[10].mxu0 }
 0x51f   :  { %v1122_v36 = vadd.f32 %v1121_v34, %v997_v32  ;;  %v2360_v37 = vpop.f32.mrb[11].mxu0  ;;  %v1199_v43 = vmax.f32 %v3063_v35, 0.0  ;;  %v1564_v32 = vld [vmem:[#allocation5 + $0x250] sm:$0xff]  ;;  %v1563_v33 = vld [vmem:[#allocation5 + $0x248] sm:$0xff]  ;;  %v1566_v34 = vld [vmem:[#allocation5 + $0x260] sm:$0xff] }
 0x520   :  { %v1758_v37 = vld [vmem:[#allocation5 + $0x2e8] sm:$0xff] }
 0x521   :  { %v3065_v39 = vadd.f32 %v1165_v38, %v1122_v36  ;;  %v1002_v40 = vpop.f32.mrb[8].mxu1  ;;  %v1565_v36 = vld [vmem:[#allocation5 + $0x258] sm:$0xff]  ;;  %v1567_v38 = vld [vmem:[#allocation5 + $0x268] sm:$0xff] }
 0x522   :  { %v2334_v41 = vpop.f32.mrb[9].mxu1  ;;  %v1126_v42 = vpop.f32.mrb[12].mxu0 }
 0x523   :  { %v1200_v44 = vmax.f32 %v3065_v39, 0.0  ;;  %v1127_v45 = vadd.f32 %v1126_v42, %v1002_v40  ;;  %v2363_v46 = vpop.f32.mrb[13].mxu0  ;;  %v1760_v40 = vld [vmem:[#allocation5 + $0x2f8] sm:$0xff]  ;;  %v1759_v41 = vld [vmem:[#allocation5 + $0x2f0] sm:$0xff]  ;;  %v1762_v42 = vld [vmem:[#allocation5 + $0x308] sm:$0xff] }
 0x524   :  { %v1764_v46 = vld [vmem:[#allocation5 + $0x318] sm:$0x3] }
 0x525   :  { %v1007_v48 = vpop.f32.mrb[10].mxu1  ;;  %v2720_v49 = vpack.i.bf16 %v1200_v44, %v1199_v43  ;;  %v3073_v52 = vadd.f32 %v1170_v47, %v1127_v45  ;;  %v1761_v45 = vld [vmem:[#allocation5 + $0x300] sm:$0xff]  ;;  %v1763_v47 = vld [vmem:[#allocation5 + $0x310] sm:$0xff] }
 0x526   :  { %v2337_v50 = vpop.f32.mrb[11].mxu1  ;;  %v1131_v51 = vpop.f32.mrb[14].mxu0 }
 0x527   :  { %v1132_v53 = vadd.f32 %v1131_v51, %v1007_v48  ;;  %v2366_v54 = vpop.f32.mrb[15].mxu0  ;;  %2721 = vrot.lane.b32.xlu1 %v2720_v49, %s2826_s1  ;;  %2716 = vrot.lane.b32.xlu0 %v2720_v49, %s2823_s7  ;;  %v1201_v60 = vmax.f32 %v3073_v52, 0.0  ;;  %v1938_v48 = vld [vmem:[#allocation5 + $0x328] sm:$0xf] }
 0x528   :  { %v1277_v54 = vsel %vm50_vm5, %v1199_v43, 0.0 }
 0x529   :  { %v3077_v56 = vadd.f32 %v1175_v55, %v1132_v53  ;;  %v1012_v57 = vpop.f32.mrb[12].mxu1  ;;  %v1278_v55 = vsel %vm50_vm5, %v1200_v44, 0.0 }
 0x52a   :  { %v2340_v58 = vpop.f32.mrb[13].mxu1  ;;  %v1136_v59 = vpop.f32.mrb[16].mxu0 }
 0x52b   :  { %v1202_v0 = vmax.f32 %v3077_v56, 0.0  ;;  %v1137_v61 = vadd.f32 %v1136_v59, %v1012_v57  ;;  %v2369_v62 = vpop.f32.mrb[17].mxu0 }
 0x52d   :  { %v1017_v1 = vpop.f32.mrb[14].mxu1  ;;  %v2730_v2 = vpack.i.bf16 %v1202_v0, %v1201_v60  ;;  %v3085_v6 = vadd.f32 %v1180_v63, %v1137_v61 }
 0x52e   :  { %v2343_v3 = vpop.f32.mrb[15].mxu1  ;;  %v1141_v4 = vpop.f32.mrb[18].mxu0 }
 0x52f   :  { %v1142_v7 = vadd.f32 %v1141_v4, %v1017_v1  ;;  %v2372_v9 = vpop.f32.mrb[19].mxu0  ;;  %2731 = vrot.lane.b32.xlu1 %v2730_v2, %s2826_s1  ;;  %2726 = vrot.lane.b32.xlu0 %v2730_v2, %s2823_s7  ;;  %v1203_v21 = vmax.f32 %v3085_v6, 0.0 }
 0x531   :  { %v3089_v12 = vadd.f32 %v1185_v11, %v1142_v7  ;;  %v1022_v13 = vpop.f32.mrb[16].mxu1 }
 0x532   :  { %v1146_v14 = vpop.f32.mrb[20].mxu0  ;;  %v2346_v15 = vpop.f32.mrb[17].mxu1 }
 0x533   :  { %v1204_v22 = vmax.f32 %v3089_v12, 0.0  ;;  %v1147_v23 = vadd.f32 %v1146_v14, %v1022_v13  ;;  %v2375_v24 = vpop.f32.mrb[21].mxu0  ;;  %v1279_v13 = vsel %vm50_vm5, %v1201_v60, 0.0  ;;  %v1280_v14 = vsel %vm50_vm5, %v1202_v0, 0.0 }
 0x535   :  { %v1198_v26 = vadd.f32 %v1190_v25, %v1147_v23  ;;  %v2740_v27 = vpack.i.bf16 %v1204_v22, %v1203_v21 }
 0x537   :  { %2741 = vrot.lane.b32.xlu1 %v2740_v27, %s2826_s1  ;;  %2736 = vrot.lane.b32.xlu0 %v2740_v27, %s2823_s7  ;;  %v3099_v29 = vmax.f32 %v1198_v26, 0.0 }
 0x53b   :  { %1246 = vrot.lane.b32.xlu1 %v3099_v29, %s2826_s1  ;;  %1225 = vrot.lane.b32.xlu0 %v3099_v29, %s2823_s7 }
 0x53f   :  { %1602 = vperm.xlu1 %2673, %v1569_v30   ;;  %1597 = vperm.xlu0 %2674, %v1568_v31  }
 0x543   :  { %1577 = vperm.xlu1 %2673, %v1564_v32   ;;  %1572 = vperm.xlu0 %2674, %v1563_v33  }
 0x547   :  { %1587 = vperm.xlu1 %2673, %v1566_v34   ;;  %1582 = vperm.xlu0 %2674, %v1565_v36  }
 0x54b   :  { %1767 = vperm.xlu1 %2673, %v1758_v37   ;;  %1592 = vperm.xlu0 %2674, %v1567_v38   ;;  %v1281_v37 = vsel %vm50_vm5, %v1203_v21, 0.0  ;;  %v1282_v38 = vsel %vm50_vm5, %v1204_v22, 0.0 }
 0x54f   :  { %1777 = vperm.xlu1 %2673, %v1760_v40   ;;  %1772 = vperm.xlu0 %2674, %v1759_v41  }
 0x553   :  { %1787 = vperm.xlu1 %2673, %v1762_v42   ;;  %1782 = vperm.xlu0 %2674, %v1761_v45  }
 0x557   :  { %1797 = vperm.xlu1 %2673, %v1764_v46   ;;  %1792 = vperm.xlu0 %2674, %v1763_v47  }
 0x55b   :  { %1941 = vperm.xlu0 %2674, %v1938_v48  }
 0x599   :  { %v2722_v49 = vpop.permute.xlu1 %2721  ;;  %v2717_v50 = vpop.permute.xlu0 %2716 }
 0x59a   :  { %v2719_v51 = vunpack.i.h.bf16 %v2717_v50  ;;  %v2718_v53 = vunpack.i.l.bf16 %v2717_v50  ;;  %v2724_v57 = vunpack.i.h.bf16 %v2722_v49  ;;  %v2723_v58 = vunpack.i.l.bf16 %v2722_v49 }
 0x59c   :  { %v1256_v59 = vsel %vm861_vm2, 0.0, %v2719_v51  ;;  %v1255_v61 = vsel %vm861_vm2, 0.0, %v2718_v53  ;;  %v1284_v62 = vsel %vm870_vm4, %v1277_v54, %v2718_v53  ;;  %v1285_v63 = vsel %vm870_vm4, %v1278_v55, %v2719_v51  ;;  %v1619_v55 = vld [vmem:[#allocation5 + $0x280] sm:$0xff] }
 0x59d   :  { %v1263_v39 = vsel %vm870_vm4, %v1256_v59, 0.0  ;;  %v1262_v43 = vsel %vm870_vm4, %v1255_v61, 0.0  ;;  %v2569_v44 = vpack.c.bf16 %v1285_v63, %v1284_v62  ;;  %v1283_v51 = vsel %vm50_vm5, %v3099_v29, 0.0  ;;  %v1306_v59 = vld [vmem:[#allocation5 + $0x210] sm:$0xff]  ;;  %v1299_v62 = vld [vmem:[#allocation5 + $0x1d8] sm:$0xff] }
 0x59e   :  { %v1271_v1 = vsel %vm1269_vm9, %v1263_v39, %v2724_v57  ;;  %v1270_v2 = vsel %vm1269_vm9, %v1262_v43, %v2723_v58  ;;  %v1620_v57 = vld [vmem:[#allocation5 + $0x288] sm:$0xff]  ;;  %v1307_v39 = vld [vmem:[#allocation5 + $0x218] sm:$0xff]  ;;  %v1300_v43 = vld [vmem:[#allocation5 + $0x1e0] sm:$0xff]  ;;  %vm1629_vm5 = vcmask 326656  }
 0x59f   :  { %2571 = vmatpush3.bf16.msk.msra.mxu1 %vm3117_vm10, %v2569_v44  ;;  %v2581_v3 = vpack.c.bf16 %v1271_v1, %v1270_v2  ;;  %v2590_v63 = vpack.c.bf16 %v1620_v57, %v1619_v55  ;;  %v1308_v44 = vld [vmem:[#allocation5 + $0x220] sm:$0xff]  ;;  %v1301_v1 = vld [vmem:[#allocation5 + $0x1e8] sm:$0xff] }
 0x5a0   :  { %2572 = vmatprep.subr.bf16.mxu1 %v2825_v5  ;;  %v1309_v2 = vld [vmem:[#allocation5 + $0x228] sm:$0xff] }
 0x5a1   :  { %2582 = vmatpush3.bf16.msra.mxu0 %v2581_v3  ;;  %v2732_v4 = vpop.permute.xlu1 %2731  ;;  %v2727_v7 = vpop.permute.xlu0 %2726  ;;  %v1302_v3 = vld [vmem:[#allocation5 + $0x1f0] sm:$0xff] }
 0x5a2   :  { %v2729_v9 = vunpack.i.h.bf16 %v2727_v7  ;;  %v2728_v11 = vunpack.i.l.bf16 %v2727_v7  ;;  %2583 = vmatprep.subr.bf16.mxu0 %v2825_v5  ;;  %v2734_v15 = vunpack.i.h.bf16 %v2732_v4  ;;  %v2733_v23 = vunpack.i.l.bf16 %v2732_v4  ;;  %v1310_v4 = vld [vmem:[#allocation5 + $0x230] sm:$0xff]  ;;  %v1303_v7 = vld [vmem:[#allocation5 + $0x1f8] sm:$0xff] }
 0x5a4   :  { %v1258_v24 = vsel %vm861_vm2, 0.0, %v2729_v9  ;;  %v1257_v25 = vsel %vm861_vm2, 0.0, %v2728_v11  ;;  %v1286_v26 = vsel %vm870_vm4, %v1279_v13, %v2728_v11  ;;  %v1287_v27 = vsel %vm870_vm4, %v1280_v14, %v2729_v9  ;;  %v1311_v9 = vld [vmem:[#allocation5 + $0x238] sm:$0xff]  ;;  %v1304_v11 = vld [vmem:[#allocation5 + $0x200] sm:$0xff]  ;;  %v1305_v14 = vld [vmem:[#allocation5 + $0x208] sm:$0x3] }
 0x5a5   :  { %v1265_v30 = vsel %vm870_vm4, %v1258_v24, 0.0  ;;  %v1264_v52 = vsel %vm870_vm4, %v1257_v25, 0.0  ;;  %v2573_v31 = vpack.c.bf16 %v1287_v27, %v1286_v26  ;;  %v1312_v13 = vld [vmem:[#allocation5 + $0x240] sm:$0x3] }
 0x5a6   :  { %v1273_v60 = vsel %vm1269_vm9, %v1265_v30, %v2734_v15  ;;  %v1272_v56 = vsel %vm1269_vm9, %v1264_v52, %v2733_v23  ;;  %v1621_v15 = vld [vmem:[#allocation5 + $0x290] sm:$0xff]  ;;  %v1622_v23 = vld [vmem:[#allocation5 + $0x298] sm:$0xff]  ;;  %v1623_v25 = vld [vmem:[#allocation5 + $0x2a0] sm:$0xff] }
 0x5a7   :  { %2575 = vmatpush3.bf16.msk.msra.mxu1 %vm3117_vm10, %v2573_v31  ;;  %v2584_v0 = vpack.c.bf16 %v1273_v60, %v1272_v56  ;;  %v2593_v24 = vpack.c.bf16 %v1622_v23, %v1621_v15 }
 0x5a8   :  { %2576 = vmatprep.subr.bf16.mxu1 %v2825_v5 }
 0x5a9   :  { %2585 = vmatpush3.bf16.msra.mxu0 %v2584_v0  ;;  %v2742_v32 = vpop.permute.xlu1 %2741  ;;  %v2737_v33 = vpop.permute.xlu0 %2736 }
 0x5aa   :  { %v2739_v34 = vunpack.i.h.bf16 %v2737_v33  ;;  %v2738_v36 = vunpack.i.l.bf16 %v2737_v33  ;;  %2586 = vmatprep.subr.bf16.mxu0 %v2825_v5  ;;  %v2744_v40 = vunpack.i.h.bf16 %v2742_v32  ;;  %v2743_v41 = vunpack.i.l.bf16 %v2742_v32 }
 0x5ac   :  { %v1260_v42 = vsel %vm861_vm2, 0.0, %v2739_v34  ;;  %v1259_v45 = vsel %vm861_vm2, 0.0, %v2738_v36  ;;  %v1288_v46 = vsel %vm870_vm4, %v1281_v37, %v2738_v36  ;;  %v1289_v47 = vsel %vm870_vm4, %v1282_v38, %v2739_v34 }
 0x5ad   :  { %v1267_v48 = vsel %vm870_vm4, %v1260_v42, 0.0  ;;  %v1266_v6 = vsel %vm870_vm4, %v1259_v45, 0.0  ;;  %v2577_v49 = vpack.c.bf16 %v1289_v47, %v1288_v46  ;;  %v1226_v21 = vpop.permute.xlu0 %1225  ;;  %v1247_v29 = vpop.permute.xlu1 %1246 }
 0x5ae   :  { %v1275_v12 = vsel %vm1269_vm9, %v1267_v48, %v2744_v40  ;;  %v1274_v22 = vsel %vm1269_vm9, %v1266_v6, %v2743_v41  ;;  %v1261_v50 = vsel %vm861_vm2, 0.0, %v1226_v21  ;;  %v1290_v53 = vsel %vm870_vm4, %v1283_v51, %v1226_v21 }
 0x5af   :  { %2579 = vmatpush3.bf16.msk.msra.mxu1 %vm3117_vm10, %v2577_v49  ;;  %v2587_v54 = vpack.c.bf16 %v1275_v12, %v1274_v22  ;;  %v1268_v58 = vsel %vm870_vm4, %v1261_v50, 0.0  ;;  %v1298_v61 = vsel %vm1291_vm8, %v1290_v53, 0.0 }
 0x5b0   :  { %2388 = vmatprep.subr.mxu1 %v2828_v19  ;;  %v1276_v35 = vsel %vm1269_vm9, %v1268_v58, %v1247_v29 }
 0x5b1   :  { %2588 = vmatpush3.bf16.msra.mxu0 %v2587_v54 }
 0x5b2   :  { %2423 = vmatprep.subr.mxu0 %v2828_v19 }
 0x5b3   :  { %2389 = vmatpush3.msk.msra.mxu1 %vm1335_vm11, %v1298_v61 }
 0x5b4   :  { %2391 = vmatmul.mubr.msk.f32.vlgmr.msra.gmra.mrb[18].mxu1 %vm1313_vm12, %v1306_v59  ;;  %2611 = vmatprep.subr.bf16.mxu1 %v2825_v5 }
 0x5b5   :  { %2424 = vmatpush3.msk.msra.mxu0 %vm1335_vm11, %v1276_v35  ;;  %2393 = vmatprep.mubr.msk.f32.mxu1 %vm2827_vm0, %v2828_v19 }
 0x5b6   :  { %2426 = vmatmul.mubr.msk.f32.vlgmr.msra.gmra.mrb[22].mxu0 %vm1313_vm12, %v1299_v62  ;;  %2589 = vmatprep.subr.bf16.mxu0 %v2825_v5 }
 0x5b7   :  { %2428 = vmatprep.mubr.msk.f32.mxu0 %vm2827_vm0, %v2828_v19  ;;  %2591 = vmatpush3.bf16.msra.mxu0 %v2590_v63 }
 0x5b8   :  { %2394 = vmatmul.mubr.msk.f32.gmra.mrb[20].mxu1 %vm1313_vm12, %v1307_v39  ;;  %2592 = vmatprep.subr.bf16.mxu0 %v2825_v5 }
 0x5b9   :  { %2396 = vmatprep.mubr.msk.f32.mxu1 %vm2827_vm0, %v2828_v19  ;;  %2614 = vmatpush3.bf16.msra.mxu1 %v2590_v63 }
 0x5ba   :  { %2429 = vmatmul.mubr.msk.f32.gmra.mrb[24].mxu0 %vm1313_vm12, %v1300_v43  ;;  %2612 = vmatprep.subr.bf16.mxu1 %v2825_v5 }
 0x5bb   :  { %2431 = vmatprep.mubr.msk.f32.mxu0 %vm2827_vm0, %v2828_v19  ;;  %2594 = vmatpush3.bf16.msra.mxu0 %v2593_v24 }
 0x5bc   :  { %2397 = vmatmul.mubr.msk.f32.gmra.mrb[22].mxu1 %vm1313_vm12, %v1308_v44  ;;  %2454 = vmatprep.subr.mxu0 %v2828_v19 }
 0x5bd   :  { %2399 = vmatprep.mubr.msk.f32.mxu1 %vm2827_vm0, %v2828_v19  ;;  %2615 = vmatpush3.bf16.msra.mxu1 %v2593_v24 }
 0x5be   :  { %2432 = vmatmul.mubr.msk.f32.gmra.mrb[26].mxu0 %vm1313_vm12, %v1301_v1  ;;  %2613 = vmatprep.subr.mxu1 %v2828_v19  ;;  %v1598_v26 = vpop.permute.xlu0 %1597  ;;  %v1603_v52 = vpop.permute.xlu1 %1602 }
 0x5bf   :  { %2434 = vmatprep.mubr.msk.f32.mxu0 %vm2827_vm0, %v2828_v19  ;;  %2455 = vmatpush3.msra.mxu0 %v1623_v25 }
 0x5c0   :  { %2400 = vmatmul.mubr.msk.f32.gmra.mrb[24].mxu1 %vm1313_vm12, %v1309_v2  ;;  %2602 = vmatprep.subr.bf16.mxu0 %v2825_v5 }
 0x5c1   :  { %2402 = vmatprep.mubr.msk.f32.mxu1 %vm2827_vm0, %v2828_v19  ;;  %2616 = vmatpush3.msra.mxu1 %v1623_v25 }
 0x5c2   :  { %2435 = vmatmul.mubr.msk.f32.gmra.mrb[28].mxu0 %vm1313_vm12, %v1302_v3  ;;  %2595 = vmatprep.subr.bf16.mxu1 %v2825_v5  ;;  %v1573_v0 = vpop.permute.xlu0 %1572  ;;  %v1578_v41 = vpop.permute.xlu1 %1577 }
 0x5c3   :  { %2437 = vmatprep.mubr.msk.f32.mxu0 %vm2827_vm0, %v2828_v19 }
 0x5c4   :  { %2403 = vmatmul.mubr.msk.f32.gmra.mrb[26].mxu1 %vm1313_vm12, %v1310_v4 }
 0x5c5   :  { %2405 = vmatprep.mubr.msk.f32.mxu1 %vm2827_vm0, %v2828_v19 }
 0x5c6   :  { %2438 = vmatmul.mubr.msk.f32.gmra.mrb[30].mxu0 %vm1313_vm12, %v1303_v7  ;;  %v1583_v21 = vpop.permute.xlu0 %1582  ;;  %v1588_v57 = vpop.permute.xlu1 %1587 }
 0x5c7   :  { %2440 = vmatprep.mubr.msk.f32.mxu0 %vm2827_vm0, %v2828_v19 }
 0x5c8   :  { %2406 = vmatmul.mubr.msk.f32.gmra.mrb[28].mxu1 %vm1313_vm12, %v1311_v9 }
 0x5c9   :  { %2408 = vmatprep.mubr.msk.f32.mxu1 %vm2827_vm0, %v2828_v19 }
 0x5ca   :  { %2441 = vmatmul.mubr.msk.f32.gmra.mrb[32].mxu0 %vm1313_vm12, %v1304_v11  ;;  %v1593_v39 = vpop.permute.xlu0 %1592 }
 0x5cb   :  { %2443 = vmatprep.mubr.msk.f32.mxu0 %vm2827_vm0, %v2828_v19 }
 0x5cc   :  { %2409 = vmatmul.mubr.msk.f32.gmra.mrb[30].mxu1 %vm1313_vm12, %v1312_v13 }
 0x5cd   :  { %2471 = vmatprep.mubr.msk.f32.mxu1 %vm2827_vm0, %v2828_v19 }
 0x5ce   :  { %2444 = vmatmul.mubr.msk.f32.gmra.mrb[34].mxu0 %vm1313_vm12, %v1305_v14 }
 0x5cf   :  { %2456 = vmatprep.mubr.msk.f32.mxu0 %vm2827_vm0, %v2828_v19 }
 0x687   :  { %v1405_v27 = vpop.f32.mrb[18].mxu1 }
 0x688   :  { %v2392_v30 = vpop.f32.mrb[19].mxu1 }
 0x689   :  { %v1529_v31 = vpop.f32.mrb[22].mxu0 }
 0x68a   :  { %v1530_v60 = vadd.f32 %v1529_v31, %v1405_v27  ;;  %v2427_v56 = vpop.f32.mrb[23].mxu0  ;;  %v1751_v27 = vld [vmem:[#allocation5 + $0x2b0] sm:$0xff] }
 0x68b   :  { %v1410_v32 = vpop.f32.mrb[20].mxu1 }
 0x68c   :  { %v1605_v33 = vadd.f32 %v1573_v0, %v1530_v60  ;;  %v2395_v34 = vpop.f32.mrb[21].mxu1 }
 0x68d   :  { %v1534_v36 = vpop.f32.mrb[24].mxu0 }
 0x68e   :  { %v1612_v37 = vmax.f32 %v1605_v33, 0.0  ;;  %v1535_v38 = vadd.f32 %v1534_v36, %v1410_v32  ;;  %v2430_v40 = vpop.f32.mrb[25].mxu0  ;;  %v2111_v36 = vld [vmem:[#allocation5 + $0x2a8] ss:$0 sm:$0xff] }
 0x68f   :  { %v1415_v42 = vpop.f32.mrb[22].mxu1 }
 0x690   :  { %v1606_v45 = vadd.f32 %v1578_v41, %v1535_v38  ;;  %2457 = vmatmul.mubr.msk.f32.vlgmr.msra.gmra.mrb[36].mxu0 %vm1629_vm5, %v1612_v37  ;;  %v2398_v46 = vpop.f32.mrb[23].mxu1  ;;  %v1768_v38 = vpop.permute.xlu1 %1767 }
 0x691   :  { %v1539_v47 = vpop.f32.mrb[26].mxu0  ;;  %2459 = vmatprep.mubr.msk.f32.mxu0 %vm2827_vm0, %v2828_v19 }
 0x692   :  { %v1613_v48 = vmax.f32 %v1606_v45, 0.0  ;;  %v1540_v6 = vadd.f32 %v1539_v47, %v1415_v42  ;;  %v2433_v49 = vpop.f32.mrb[27].mxu0  ;;  %v1773_v47 = vpop.permute.xlu0 %1772 }
 0x693   :  { %v1420_v12 = vpop.f32.mrb[24].mxu1 }
 0x694   :  { %v1607_v22 = vadd.f32 %v1583_v21, %v1540_v6  ;;  %2460 = vmatmul.mubr.msk.f32.gmra.mrb[38].mxu0 %vm1629_vm5, %v1613_v48  ;;  %v2401_v50 = vpop.f32.mrb[25].mxu1 }
 0x695   :  { %v1544_v51 = vpop.f32.mrb[28].mxu0  ;;  %2462 = vmatprep.mubr.msk.f32.mxu0 %vm2827_vm0, %v2828_v19 }
 0x696   :  { %v1614_v53 = vmax.f32 %v1607_v22, 0.0  ;;  %v1545_v54 = vadd.f32 %v1544_v51, %v1420_v12  ;;  %v2436_v55 = vpop.f32.mrb[29].mxu0  ;;  %v1778_v22 = vpop.permute.xlu1 %1777 }
 0x697   :  { %v1425_v58 = vpop.f32.mrb[26].mxu1 }
 0x698   :  { %v1608_v59 = vadd.f32 %v1588_v57, %v1545_v54  ;;  %2463 = vmatmul.mubr.msk.f32.gmra.mrb[40].mxu0 %vm1629_vm5, %v1614_v53  ;;  %v2404_v61 = vpop.f32.mrb[27].mxu1 }
 0x699   :  { %v1549_v29 = vpop.f32.mrb[30].mxu0  ;;  %2465 = vmatprep.mubr.msk.f32.mxu0 %vm2827_vm0, %v2828_v19  ;;  %v1783_v61 = vpop.permute.xlu0 %1782 }
 0x69a   :  { %v1615_v62 = vmax.f32 %v1608_v59, 0.0  ;;  %v1550_v63 = vadd.f32 %v1549_v29, %v1425_v58  ;;  %v2439_v35 = vpop.f32.mrb[31].mxu0 }
 0x69b   :  { %v1430_v43 = vpop.f32.mrb[28].mxu1 }
 0x69c   :  { %v1609_v44 = vadd.f32 %v1593_v39, %v1550_v63  ;;  %2466 = vmatmul.mubr.msk.f32.gmra.mrb[42].mxu0 %vm1629_vm5, %v1615_v62  ;;  %v2407_v1 = vpop.f32.mrb[29].mxu1 }
 0x69d   :  { %v1554_v2 = vpop.f32.mrb[32].mxu0  ;;  %2468 = vmatprep.mubr.msk.f32.mxu0 %vm2827_vm0, %v2828_v19 }
 0x69e   :  { %v1616_v3 = vmax.f32 %v1609_v44, 0.0  ;;  %v1555_v4 = vadd.f32 %v1554_v2, %v1430_v43  ;;  %v2442_v7 = vpop.f32.mrb[33].mxu0  ;;  %v1788_v43 = vpop.permute.xlu1 %1787 }
 0x69f   :  { %v1435_v9 = vpop.f32.mrb[30].mxu1 }
 0x6a0   :  { %v1610_v11 = vadd.f32 %v1598_v26, %v1555_v4  ;;  %2469 = vmatmul.mubr.msk.f32.gmra.mrb[44].mxu0 %vm1629_vm5, %v1616_v3  ;;  %v2410_v13 = vpop.f32.mrb[31].mxu1  ;;  %v1793_v3 = vpop.permute.xlu0 %1792 }
 0x6a1   :  { %v1559_v14 = vpop.f32.mrb[34].mxu0  ;;  %2520 = vmatprep.mubr.msk.f32.mxu0 %vm2827_vm0, %v2828_v19  ;;  %v2640_v13 = vadd.f32 %v2111_v36, %v1793_v3 }
 0x6a2   :  { %v1617_v15 = vmax.f32 %v1610_v11, 0.0  ;;  %v1560_v23 = vadd.f32 %v1559_v14, %v1435_v9  ;;  %v2445_v24 = vpop.f32.mrb[35].mxu0  ;;  %v1798_v14 = vpop.permute.xlu1 %1797 }
 0x6a4   :  { %v1611_v25 = vadd.f32 %v1603_v52, %v1560_v23  ;;  %2472 = vmatmul.mubr.msk.f32.vlgmr.msra.gmra.mrb[32].mxu1 %vm1629_vm5, %v1617_v15 }
 0x6a5   :  { %2597 = vmatpush3.bf16.msra.mxu1 %v2596_v17  ;;  %2474 = vmatprep.mubr.msk.f32.mxu1 %vm2827_vm0, %v2828_v19  ;;  %v1756_v17 = vld [vmem:[#allocation5 + $0x2d8] sm:$0xff] }
 0x6a6   :  { %v1618_v26 = vmax.f32 %v1611_v25, 0.0  ;;  %2598 = vmatprep.subr.bf16.mxu1 %v2825_v5  ;;  %v2642_v25 = vadd.f32 %v2111_v36, %v1798_v14 }
 0x6a8   :  { %2475 = vmatmul.mubr.msk.f32.gmra.mrb[34].mxu1 %vm1629_vm5, %v1618_v26 }
 0x6a9   :  { %2601 = vmatpush3.bf16.msk.msra.mxu1 %vm2935_vm13, %v2599_v20  ;;  %2485 = vmatprep.mubr.msk.f32.mxu1 %vm2827_vm0, %v2828_v19 }
 0x6ac   :  { %2486 = vmatmul.mubr.msk.f32.vlgmr.msra.gmra.mrb[36].mxu1 %vm354_vm6, %v1751_v27 }
 0x6ad   :  { %2488 = vmatprep.mubr.msk.f32.mxu1 %vm2827_vm0, %v2828_v19 }
 0x6b0   :  { %2489 = vmatmul.mubr.msk.f32.gmra.mrb[38].mxu1 %vm354_vm6, %v1752_v8 }
 0x6b1   :  { %2491 = vmatprep.mubr.msk.f32.mxu1 %vm2827_vm0, %v2828_v19 }
 0x6b4   :  { %2492 = vmatmul.mubr.msk.f32.gmra.mrb[40].mxu1 %vm354_vm6, %v1753_v10 }
 0x6b5   :  { %2494 = vmatprep.mubr.msk.f32.mxu1 %vm2827_vm0, %v2828_v19 }
 0x6b8   :  { %2495 = vmatmul.mubr.msk.f32.gmra.mrb[42].mxu1 %vm354_vm6, %v1754_v28 }
 0x6b9   :  { %2497 = vmatprep.mubr.msk.f32.mxu1 %vm2827_vm0, %v2828_v19 }
 0x6bc   :  { %2498 = vmatmul.mubr.msk.f32.gmra.mrb[44].mxu1 %vm354_vm6, %v1755_v16 }
 0x6bd   :  { %2500 = vmatprep.mubr.msk.f32.mxu1 %vm2827_vm0, %v2828_v19 }
 0x6c0   :  { %2501 = vmatmul.mubr.msk.f32.gmra.mrb[32].mxu1 %vm354_vm6, %v1756_v17 }
 0x6c1   :  { %2503 = vmatprep.mubr.msk.f32.mxu1 %vm2827_vm0, %v2828_v19 }
 0x6c4   :  { %2504 = vmatmul.mubr.msk.f32.gmra.mrb[34].mxu1 %vm354_vm6, %v1757_v18  ;;  %v1937_v18 = vld [vmem:[#allocation5 + $0x320] sm:$0xf]  ;;  %vm2020_vm6 = vcmask 257024  }
 0x763   :  { %v1717_v20 = vpop.f32.mrb[36].mxu0 }
 0x764   :  { %v2458_v30 = vpop.f32.mrb[37].mxu0  ;;  %v1718_v37 = vadd.f32 %v2111_v36, %v1717_v20 }
 0x766   :  { %v2626_v41 = vadd.f32 %v1768_v38, %v1718_v37 }
 0x767   :  { %v1722_v52 = vpop.f32.mrb[38].mxu0 }
 0x768   :  { %v2461_v31 = vpop.f32.mrb[39].mxu0  ;;  %v1723_v40 = vadd.f32 %v2111_v36, %v1722_v52 }
 0x76a   :  { %v2629_v6 = vadd.f32 %v1773_v47, %v1723_v40 }
 0x76b   :  { %v1727_v60 = vpop.f32.mrb[40].mxu0 }
 0x76c   :  { %v2464_v56 = vpop.f32.mrb[41].mxu0  ;;  %v1728_v48 = vadd.f32 %v2111_v36, %v1727_v60 }
 0x76e   :  { %v2632_v54 = vadd.f32 %v1778_v22, %v1728_v48 }
 0x76f   :  { %v1732_v0 = vpop.f32.mrb[42].mxu0 }
 0x770   :  { %v2467_v32 = vpop.f32.mrb[43].mxu0  ;;  %v1733_v50 = vadd.f32 %v2111_v36, %v1732_v0 }
 0x772   :  { %v2635_v62 = vadd.f32 %v1783_v61, %v1733_v50 }
 0x773   :  { %v1737_v33 = vpop.f32.mrb[44].mxu0 }
 0x774   :  { %v2470_v34 = vpop.f32.mrb[45].mxu0  ;;  %v1738_v29 = vadd.f32 %v2111_v36, %v1737_v33 }
 0x776   :  { %v2638_v2 = vadd.f32 %v1788_v43, %v1738_v29 }
 0x77f   :  { %v1889_v42 = vpop.f32.mrb[36].mxu1 }
 0x780   :  { %v2627_v45 = vadd.f32 %v2626_v41, %v1889_v42  ;;  %v2487_v46 = vpop.f32.mrb[37].mxu1 }
 0x782   :  { %v1930_v51 = vmax.f32 %v2627_v45, 0.0 }
 0x783   :  { %v1894_v49 = vpop.f32.mrb[38].mxu1 }
 0x784   :  { %v2630_v21 = vadd.f32 %v2629_v6, %v1894_v49  ;;  %v2490_v12 = vpop.f32.mrb[39].mxu1 }
 0x786   :  { %v1931_v53 = vmax.f32 %v2630_v21, 0.0 }
 0x787   :  { %v1899_v55 = vpop.f32.mrb[40].mxu1 }
 0x788   :  { %v2603_v57 = vpack.c.bf16 %v1931_v53, %v1930_v51  ;;  %v2633_v58 = vadd.f32 %v2632_v54, %v1899_v55  ;;  %v2493_v59 = vpop.f32.mrb[41].mxu1 }
 0x78a   :  { %2604 = vmatpush3.bf16.msra.mxu0 %v2603_v57  ;;  %v1932_v44 = vmax.f32 %v2633_v58, 0.0 }
 0x78b   :  { %v1904_v63 = vpop.f32.mrb[42].mxu1  ;;  %2605 = vmatprep.subr.bf16.mxu0 %v2825_v5 }
 0x78c   :  { %v2636_v35 = vadd.f32 %v2635_v62, %v1904_v63  ;;  %v2496_v39 = vpop.f32.mrb[43].mxu1 }
 0x78e   :  { %v1933_v1 = vmax.f32 %v2636_v35, 0.0 }
 0x78f   :  { %v1909_v4 = vpop.f32.mrb[44].mxu1 }
 0x790   :  { %v2606_v7 = vpack.c.bf16 %v1933_v1, %v1932_v44  ;;  %v2639_v9 = vadd.f32 %v2638_v2, %v1909_v4  ;;  %v2499_v11 = vpop.f32.mrb[45].mxu1 }
 0x792   :  { %2607 = vmatpush3.bf16.msra.mxu0 %v2606_v7  ;;  %v1934_v26 = vmax.f32 %v2639_v9, 0.0 }
 0x793   :  { %v1914_v15 = vpop.f32.mrb[32].mxu1  ;;  %2608 = vmatprep.subr.bf16.mxu0 %v2825_v5  ;;  %v1942_v5 = vpop.permute.xlu0 %1941 }
 0x794   :  { %v2641_v23 = vadd.f32 %v2640_v13, %v1914_v15  ;;  %v2502_v24 = vpop.f32.mrb[33].mxu1 }
 0x796   :  { %v1935_v27 = vmax.f32 %v2641_v23, 0.0 }
 0x797   :  { %v1919_v8 = vpop.f32.mrb[34].mxu1 }
 0x798   :  { %v2609_v10 = vpack.c.bf16 %v1935_v27, %v1934_v26  ;;  %v2643_v28 = vadd.f32 %v2642_v25, %v1919_v8  ;;  %v2505_v16 = vpop.f32.mrb[35].mxu1 }
 0x79a   :  { %2610 = vmatpush3.bf16.msra.mxu0 %v2609_v10  ;;  %v1936_v17 = vmax.f32 %v2643_v28, 0.0 }
 0x79b   :  { %2518 = vmatprep.subr.mxu0 %v2828_v19 }
 0x79e   :  { %2519 = vmatpush3.msk.msra.mxu0 %vm1335_vm11, %v1936_v17 }
 0x79f   :  { %2521 = vmatmul.mubr.msk.f32.vlgmr.msra.gmra.mrb[46].mxu0 %vm1313_vm12, %v1937_v18 }
 0x872   :  { %v2016_v20 = vpop.f32.mrb[46].mxu0 }
 0x873   :  { %v2017_v30 = vadd.f32 %v2016_v20, %v1942_v5  ;;  %v2522_v52 = vpop.f32.mrb[47].mxu0 }
 0x875   :  { %2021 = vst.msk [vmem:[#allocation7] sm:$0xf] %vm2020_vm6, %v2017_v30 }
 0x876   :  { %2800 = shalt.err (!%p2797_p6)
}
 0x877   :  { %s2801_s13 = scalar_lea.hbm %s3292_s2, 64 }
 0x878   :  { %p2802_p7 = scmp.ne.s32.totalorder %s3292_s2, %s2801_s13  ;;  %p2805_p8 = scmp.lt.u32.totalorder %s2801_s13, %s3292_s2 }
 0x87a   :  { %p2807_p9 = pnand %p2805_p8, %p2802_p7 }
 0x87c   :  { %2810 = shalt.err (!%p2807_p9)
}
 0x87d   :  { %2031 = dma.vmem_to_hbm [thread:$0]  %s2029_s9, 64, %s3292_s2, [#allocation4]  }
 0x87e   :  { %2815 = dma.done.wait [#allocation4], 64  }
 0x87f   :  { %2816 = vsyncadd [#allocation4], 4294967232 }
 0x880   :  { %2035 = vsyncpa [#allocation3], 1 }
 0x881   :  { %2036 = vsyncpa [#allocation6], 1 }
 0x882   :  { %2037 = vsyncpa [#allocation4], 1 }

</bundles_post_ra>
